<compile_context>
chip_gen: v5e
topology: v5e:2x2
jax: 0.10.0
libtpu: 0.0.40
codegen_flags: <defaults>
</compile_context>

<pallas_src>
import functools

import jax
import jax.numpy as jnp
from jax.experimental import pallas as pl
from jax.experimental.pallas import tpu as pltpu


def _round_up(n, m):
    return ((n + m - 1) // m) * m


def _sigmoid(x):
    # Argument is always a vector norm (>= 0) -> exp(-x) <= 1, no overflow.
    return 1.0 / (1.0 + jnp.exp(-x))


def _lrelu(x):
    # LeakyReLU(0.2): slope 0.2 > 0 so max(x, 0.2x) == leaky_relu (single VPU max).
    return jnp.maximum(x, 0.2 * x)


# ---------------------------------------------------------------------------
# Kernel: whole DiscHeads forward for one batch tile.
# ---------------------------------------------------------------------------
def disc_heads_kernel(
    x_a_ref, x_v_ref,
    wa1r_ref, warest_ref, wv1r_ref, wvrest_ref, bias_ref, whead_ref,
    out_ref,
    *, adim, vdim, rank, tb, norm_a, norm_v,
):
    f32, bf16 = jnp.float32, jnp.bfloat16

    def mm(a, w):
        # bf16 MXU operands, f32 accumulate; elementwise math stays f32
        # (portable to v5e whose VPU/EUP have no bf16).
        return jnp.dot(a.astype(bf16), w, preferred_element_type=f32)

    def vecsig(m):
        # VectorSigmoid: scale each 3-vector by sigmoid of its L2 norm.
        # (3*tb, C) <-> (3, tb, C) reshapes are tile-aligned (tb % 8 == 0),
        # so no sublane concat/split copies are materialized.
        c = m.shape[-1]
        x3 = m.reshape(3, tb, c)
        gate = _sigmoid(jnp.sqrt((x3 * x3).sum(axis=0)))
        return (x3 * gate[None]).reshape(3 * tb, c)

    # DiscHeads input scaling (norm_a / norm_v) fused into the kernel.
    x_a = x_a_ref[...] * norm_a                                # (tb, adim)   f32
    x_v = x_v_ref[...].reshape(3 * tb, vdim) * norm_v          # (3*tb, vdim) f32

    for l in range(3):                                         # res1, res2, res3
        # ---- static slices of the packed, VMEM-resident parameter slabs ----
        wa1r = wa1r_ref[l]                                     # (adim, adim+rank)  [wa1 | war]
        wa2 = warest_ref[l, 0:adim, :]                         # (adim, adim)
        wa3r = warest_ref[l, adim:2 * adim + rank, :]          # (adim+rank, adim)  [wa3; wra]
        wv1r = wv1r_ref[l]                                     # (vdim, vdim+rank)  [wv1 | wvr]
        wv2 = wvrest_ref[l, 0:vdim, :]                         # (vdim, vdim)
        wv3r = wvrest_ref[l, vdim:2 * vdim + rank, :]          # (vdim+rank, vdim)  [wv3; wrv]
        ba1 = bias_ref[l, 0:1, :]                              # (1, adim)
        bar = bias_ref[l, 1:2, 0:rank]                         # (1, rank)
        ba2 = bias_ref[l, 2:3, :]                              # (1, adim)
        ba3r = bias_ref[l, 3:4, :]                             # (1, adim)  ba3 + bra (pre-summed)

        # ---- fused: first scalar Linear + ScalVecProducts a->rank projection ----
        t_a = mm(x_a, wa1r)                                    # (tb, adim+rank)
        h1 = _lrelu(t_a[:, 0:adim] + ba1)
        a_r = t_a[:, adim:adim + rank] + bar                   # (tb, rank)

        # ---- fused: first VecLinear + ScalVecProducts v->rank projection ----
        t_v = mm(x_v, wv1r)                                    # (3*tb, vdim+rank)
        hv = vecsig(t_v[:, 0:vdim])
        v_r3 = t_v[:, vdim:vdim + rank].reshape(3, tb, rank)   # (3, tb, rank)

        # ---- MLP middle layers ----
        h2 = _lrelu(mm(h1, wa2) + ba2)                         # (tb, adim)
        hv2 = vecsig(mm(hv, wv2))                              # (3*tb, vdim)

        # ---- ScalVecProducts invariants ----
        sq = (v_r3 * v_r3).sum(axis=0)                         # (tb, rank)   |v_r|^2
        av = (v_r3 * a_r[None]).reshape(3 * tb, rank)          # (3*tb, rank) a_r * v_r

        # ---- fused last dots: y + p in ONE MXU pass per branch ----
        z_a = mm(jnp.concatenate([h2, a_r * sq], axis=1), wa3r) + ba3r   # (tb, adim)
        z_v = mm(jnp.concatenate([hv2, av], axis=1), wv3r)               # (3*tb, vdim)

        # ---- residual combine (f32 VPU math) ----
        x_a = x_a + z_a * 0.5
        x_v = x_v + z_v * (1.0 / 20.0)

    # ---- heads: one fused dot of [x_a | ||x_v||] against packed [lin_a; lin_v] ----
    x_v3 = x_v.reshape(3, tb, vdim)
    vnorms = jnp.sqrt((x_v3 * x_v3).sum(axis=0))               # (tb, vdim)
    out_ref[...] = mm(jnp.concatenate([x_a, vnorms], axis=1), whead_ref[...])


# ---------------------------------------------------------------------------
# Host-side parameter packing (done once, outside the hot path)
# ---------------------------------------------------------------------------
def _pack_params(params):
    bf16 = jnp.bfloat16
    adim = params["res1"]["wa1"].shape[0]
    vdim = params["res1"]["wv1"].shape[0]
    rank = params["res1"]["war"].shape[1]
    assert rank <= adim

    wa1r, warest, wv1r, wvrest, bias = [], [], [], [], []
    for name in ("res1", "res2", "res3"):
        p = params[name]
        wa1r.append(jnp.concatenate([p["wa1"], p["war"]], axis=1))
        warest.append(jnp.concatenate([p["wa2"], p["wa3"], p["wra"]], axis=0))
        wv1r.append(jnp.concatenate([p["wv1"], p["wvr"]], axis=1))
        wvrest.append(jnp.concatenate([p["wv2"], p["wv3"], p["wrv"]], axis=0))
        bar_pad = jnp.pad(p["bar"], ((0, 0), (0, adim - rank)))
        bias.append(jnp.concatenate(
            [p["ba1"], bar_pad, p["ba2"], p["ba3"] + p["bra"]], axis=0))

    wa1r = jnp.stack(wa1r).astype(bf16)       # (3, adim, adim+rank)
    warest = jnp.stack(warest).astype(bf16)   # (3, 2*adim+rank, adim)
    wv1r = jnp.stack(wv1r).astype(bf16)       # (3, vdim, vdim+rank)
    wvrest = jnp.stack(wvrest).astype(bf16)   # (3, 2*vdim+rank, vdim)
    bias = jnp.stack(bias)                    # (3, 4, adim) f32
    whead = jnp.concatenate([params["lin_a"], params["lin_v"]],
                            axis=0).astype(bf16)            # (adim+vdim, heads)
    return wa1r, warest, wv1r, wvrest, bias, whead, (adim, vdim, rank)


# ---------------------------------------------------------------------------
# Wrapper
# ---------------------------------------------------------------------------
def disc_heads(x_a, x_v, params, *, poly_len, tb=None):
    """x_a: (B, adim) f32, x_v: (B, vdim, 3) f32 (PyTorch layout) -> (B, heads)."""
    B, adim_in = x_a.shape
    heads = params["lin_a"].shape[1]

    wa1r, warest, wv1r, wvrest, bias, whead, (adim, vdim, rank) = _pack_params(params)
    assert adim_in == adim

    # Component-major layout (3, B, vdim): each VecLinear becomes one lane-aligned
    # matmul with the 3 spatial components folded into the M dimension.
    x_vc = jnp.transpose(x_v, (2, 0, 1)).astype(jnp.float32)

    if tb is None:
        # >= 2 grid steps whenever B allows it, so dimension_semantics=('parallel',)
        # shards the batch over v7x's 2 TensorCores; up to 512 rows/step for large B
        # (VMEM per step stays well under 1 MiB on every generation).
        tb = min(512, max(8, _round_up((B + 1) // 2, 8)))
    bp = _round_up(B, tb)
    if bp != B:
        x_a = jnp.pad(x_a, ((0, bp - B), (0, 0)))
        x_vc = jnp.pad(x_vc, ((0, 0), (0, bp - B), (0, 0)))

    kernel = functools.partial(
        disc_heads_kernel,
        adim=adim, vdim=vdim, rank=rank, tb=tb,
        norm_a=1.0 / poly_len, norm_v=0.02 / poly_len,
    )

    def resident(arr):
        # Constant block index -> fetched once, stays VMEM-resident across steps.
        zeros = (0,) * arr.ndim
        return pl.BlockSpec(arr.shape, lambda i, _z=zeros: _z)

    out = pl.pallas_call(
        kernel,
        out_shape=jax.ShapeDtypeStruct((bp, heads), jnp.float32),
        grid_spec=pltpu.PrefetchScalarGridSpec(
            num_scalar_prefetch=0,
            grid=(bp // tb,),
            in_specs=[
                pl.BlockSpec((tb, adim), lambda i: (i, 0)),
                pl.BlockSpec((3, tb, vdim), lambda i: (0, i, 0)),
                resident(wa1r), resident(warest),
                resident(wv1r), resident(wvrest),
                resident(bias), resident(whead),
            ],
            out_specs=pl.BlockSpec((tb, heads), lambda i: (i, 0)),
        ),
        compiler_params=pltpu.CompilerParams(
            dimension_semantics=("parallel",),     # shards batch over v7x's 2 TCs
            vmem_limit_bytes=32 * 1024 * 1024,
        ),
    )(x_a.astype(jnp.float32), x_vc, wa1r, warest, wv1r, wvrest, bias, whead)
    return out[:B]


# ---------------------------------------------------------------------------
# Pure-JAX reference (PyTorch (B, vdim, 3) layout).  Matmul operands are
# rounded to bf16 then run as plain f32 dots -> matches the kernel's
# bf16-operand / f32-accumulate MXU math without emitting BF16xBF16 XLA dots
# (which some backends cannot execute).
# ---------------------------------------------------------------------------
def _bf16_round(x):
    return x.astype(jnp.bfloat16).astype(jnp.float32)


def reference(x_a, x_v, params, *, poly_len):
    def mm(a, w):
        return jnp.dot(_bf16_round(a), _bf16_round(w))

    def veclin(v, w):                      # v: (B, Cin, 3), w: (Cin, Cout)
        return jnp.einsum("bic,io->boc", _bf16_round(v), _bf16_round(w))

    def vecsig(v):                         # (B, C, 3)
        n = jnp.sqrt(jnp.sum(v * v, axis=-1, keepdims=True))
        return v * _sigmoid(n)

    def flat_residual(x_a, x_v, p):
        h = _lrelu(mm(x_a, p["wa1"]) + p["ba1"])
        h = _lrelu(mm(h, p["wa2"]) + p["ba2"])
        y_a = mm(h, p["wa3"]) + p["ba3"]

        hv = vecsig(veclin(x_v, p["wv1"]))
        hv = vecsig(veclin(hv, p["wv2"]))
        y_v = veclin(hv, p["wv3"])

        a_r = mm(x_a, p["war"]) + p["bar"]
        v_r = veclin(x_v, p["wvr"])                      # (B, rank, 3)
        sq = jnp.sum(v_r * v_r, axis=-1)                 # (B, rank)
        p_a = mm(a_r * sq, p["wra"]) + p["bra"]
        p_v = veclin(a_r[:, :, None] * v_r, p["wrv"])
        return x_a + (y_a + p_a) / 2.0, x_v + (y_v + p_v) / 20.0

    x_a = x_a * (1.0 / poly_len)
    x_v = x_v * (0.02 / poly_len)
    x_a, x_v = flat_residual(x_a, x_v, params["res1"])
    x_a, x_v = flat_residual(x_a, x_v, params["res2"])
    x_a, x_v = flat_residual(x_a, x_v, params["res3"])
    vnorms = jnp.sqrt(jnp.sum(x_v * x_v, axis=-1))       # (B, vdim)
    return mm(x_a, params["lin_a"]) + mm(vnorms, params["lin_v"])


# ---------------------------------------------------------------------------
# Param init
# ---------------------------------------------------------------------------
def init_flat_residual(key, adim, vdim, rank):
    ks = iter(jax.random.split(key, 15))
    s, f = 0.1, jnp.float32

    def rnd(shape):
        return s * jax.random.normal(next(ks), shape, f)

    return {
        "wa1": rnd((adim, adim)), "ba1": rnd((1, adim)),
        "wa2": rnd((adim, adim)), "ba2": rnd((1, adim)),
        "wa3": rnd((adim, adim)), "ba3": rnd((1, adim)),
        "wv1": rnd((vdim, vdim)), "wv2": rnd((vdim, vdim)), "wv3": rnd((vdim, vdim)),
        "war": rnd((adim, rank)), "bar": rnd((1, rank)),
        "wra": rnd((rank, adim)), "bra": rnd((1, adim)),
        "wvr": rnd((vdim, rank)), "wrv": rnd((rank, vdim)),
    }


def init_params(key, adim, vdim, rank, heads):
    k1, k2, k3, k4, k5 = jax.random.split(key, 5)
    s, f = 0.1, jnp.float32
    return {
        "res1": init_flat_residual(k1, adim, vdim, rank),
        "res2": init_flat_residual(k2, adim, vdim, rank),
        "res3": init_flat_residual(k3, adim, vdim, rank),
        "lin_a": s * jax.random.normal(k4, (adim, heads), f),   # bias-free heads
        "lin_v": s * jax.random.normal(k5, (vdim, heads), f),
    }


if __name__ == "__main__":
    # DiscHeads config; poly_len(config) treated as a scalar constant.
    adim, vdim, rank, heads, poly_len = 32, 16, 8, 4, 24.0
    B = 12    # exercises a 2-step batch grid with padding (tb=8, bp=16)

    key = jax.random.PRNGKey(0)
    k_a, k_v, k_p = jax.random.split(key, 3)
    x_a = jax.random.normal(k_a, (B, adim), jnp.float32)
    x_v = jax.random.normal(k_v, (B, vdim, 3), jnp.float32)      # PyTorch layout
    params = init_params(k_p, adim, vdim, rank, heads)

    out = jax.block_until_ready(disc_heads(x_a, x_v, params, poly_len=poly_len))
    ref = jax.block_until_ready(reference(x_a, x_v, params, poly_len=poly_len))

    assert out.shape == (B, heads), out.shape
    assert bool(jnp.isfinite(out).all()), "non-finite output"
    max_err = float(jnp.max(jnp.abs(out - ref)))
    # Kernel and reference share the same bf16-rounded matmul operands and f32
    # accumulation; the slack only covers accumulation order and transcendental
    # library differences between backends.
    assert jnp.allclose(out, ref, atol=2e-3, rtol=2e-3), f"max abs err {max_err}"
    print("KERNEL_OK")
</pallas_src>

<mosaic_0001>
module attributes {stable_mosaic.version = 11 : i64} {
  func.func @disc_heads_kernel(%arg0: i32, %arg1: memref<8x32xf32, #tpu.memory_space<vmem>>, %arg2: memref<3x8x16xf32, #tpu.memory_space<vmem>>, %arg3: memref<3x32x40xbf16, #tpu.memory_space<vmem>>, %arg4: memref<3x72x32xbf16, #tpu.memory_space<vmem>>, %arg5: memref<3x16x24xbf16, #tpu.memory_space<vmem>>, %arg6: memref<3x40x16xbf16, #tpu.memory_space<vmem>>, %arg7: memref<3x4x32xf32, #tpu.memory_space<vmem>>, %arg8: memref<48x4xbf16, #tpu.memory_space<vmem>>, %arg9: memref<8x4xf32, #tpu.memory_space<vmem>>) attributes {dimension_semantics = [#tpu.dimension_semantics<parallel>], iteration_bounds = array<i64: 2>, scalar_prefetch = 0 : i64, scratch_operands = 0 : i64, tpu.core_type = #tpu.core_type<tc>, window_params = [{transform_indices = @transform_0, window_bounds = array<i64: 8, 32>}, {transform_indices = @transform_1, window_bounds = array<i64: 3, 8, 16>}, {pipeline_mode = #tpu.pipeline_mode<synchronous>, transform_indices = @transform_2, window_bounds = array<i64: 3, 32, 40>}, {pipeline_mode = #tpu.pipeline_mode<synchronous>, transform_indices = @transform_3, window_bounds = array<i64: 3, 72, 32>}, {pipeline_mode = #tpu.pipeline_mode<synchronous>, transform_indices = @transform_4, window_bounds = array<i64: 3, 16, 24>}, {pipeline_mode = #tpu.pipeline_mode<synchronous>, transform_indices = @transform_5, window_bounds = array<i64: 3, 40, 16>}, {pipeline_mode = #tpu.pipeline_mode<synchronous>, transform_indices = @transform_6, window_bounds = array<i64: 3, 4, 32>}, {pipeline_mode = #tpu.pipeline_mode<synchronous>, transform_indices = @transform_7, window_bounds = array<i64: 48, 4>}, {transform_indices = @transform_8, window_bounds = array<i64: 8, 4>}]} {
    %c0 = arith.constant 0 : index
    %c0_0 = arith.constant 0 : index
    %0 = vector.load %arg1[%c0, %c0_0] : memref<8x32xf32, #tpu.memory_space<vmem>>, vector<8x32xf32>
    %cst = arith.constant 0.0416666679 : f32
    %1 = vector.broadcast %cst : f32 to vector<8x32xf32>
    %2 = arith.mulf %0, %1 : vector<8x32xf32>
    %c0_1 = arith.constant 0 : index
    %c0_2 = arith.constant 0 : index
    %c0_3 = arith.constant 0 : index
    %3 = vector.load %arg2[%c0_1, %c0_2, %c0_3] : memref<3x8x16xf32, #tpu.memory_space<vmem>>, vector<3x8x16xf32>
    %4 = vector.shape_cast %3 : vector<3x8x16xf32> to vector<24x16xf32>
    %cst_4 = arith.constant 8.33333353E-4 : f32
    %5 = vector.broadcast %cst_4 : f32 to vector<24x16xf32>
    %6 = arith.mulf %4, %5 : vector<24x16xf32>
    %c0_5 = arith.constant 0 : index
    %c0_6 = arith.constant 0 : index
    %c0_7 = arith.constant 0 : index
    %7 = vector.load %arg3[%c0_5, %c0_6, %c0_7] : memref<3x32x40xbf16, #tpu.memory_space<vmem>>, vector<1x32x40xbf16>
    %8 = vector.shape_cast %7 : vector<1x32x40xbf16> to vector<32x40xbf16>
    %c0_8 = arith.constant 0 : index
    %c0_9 = arith.constant 0 : index
    %c0_10 = arith.constant 0 : index
    %9 = vector.load %arg4[%c0_8, %c0_9, %c0_10] : memref<3x72x32xbf16, #tpu.memory_space<vmem>>, vector<1x32x32xbf16>
    %10 = vector.shape_cast %9 : vector<1x32x32xbf16> to vector<32x32xbf16>
    %c0_11 = arith.constant 0 : index
    %c32 = arith.constant 32 : index
    %c0_12 = arith.constant 0 : index
    %11 = vector.load %arg4[%c0_11, %c32, %c0_12] : memref<3x72x32xbf16, #tpu.memory_space<vmem>>, vector<1x40x32xbf16>
    %12 = vector.shape_cast %11 : vector<1x40x32xbf16> to vector<40x32xbf16>
    %c0_13 = arith.constant 0 : index
    %c0_14 = arith.constant 0 : index
    %c0_15 = arith.constant 0 : index
    %13 = vector.load %arg5[%c0_13, %c0_14, %c0_15] : memref<3x16x24xbf16, #tpu.memory_space<vmem>>, vector<1x16x24xbf16>
    %14 = vector.shape_cast %13 : vector<1x16x24xbf16> to vector<16x24xbf16>
    %c0_16 = arith.constant 0 : index
    %c0_17 = arith.constant 0 : index
    %c0_18 = arith.constant 0 : index
    %15 = vector.load %arg6[%c0_16, %c0_17, %c0_18] : memref<3x40x16xbf16, #tpu.memory_space<vmem>>, vector<1x16x16xbf16>
    %16 = vector.shape_cast %15 : vector<1x16x16xbf16> to vector<16x16xbf16>
    %c0_19 = arith.constant 0 : index
    %c16 = arith.constant 16 : index
    %c0_20 = arith.constant 0 : index
    %17 = vector.load %arg6[%c0_19, %c16, %c0_20] : memref<3x40x16xbf16, #tpu.memory_space<vmem>>, vector<1x24x16xbf16>
    %18 = vector.shape_cast %17 : vector<1x24x16xbf16> to vector<24x16xbf16>
    %c0_21 = arith.constant 0 : index
    %c0_22 = arith.constant 0 : index
    %c0_23 = arith.constant 0 : index
    %19 = vector.load %arg7[%c0_21, %c0_22, %c0_23] : memref<3x4x32xf32, #tpu.memory_space<vmem>>, vector<1x1x32xf32>
    %20 = vector.shape_cast %19 : vector<1x1x32xf32> to vector<1x32xf32>
    %c0_24 = arith.constant 0 : index
    %c1 = arith.constant 1 : index
    %c0_25 = arith.constant 0 : index
    %21 = vector.load %arg7[%c0_24, %c1, %c0_25] : memref<3x4x32xf32, #tpu.memory_space<vmem>>, vector<1x1x8xf32>
    %22 = vector.shape_cast %21 : vector<1x1x8xf32> to vector<1x8xf32>
    %c0_26 = arith.constant 0 : index
    %c2 = arith.constant 2 : index
    %c0_27 = arith.constant 0 : index
    %23 = vector.load %arg7[%c0_26, %c2, %c0_27] : memref<3x4x32xf32, #tpu.memory_space<vmem>>, vector<1x1x32xf32>
    %24 = vector.shape_cast %23 : vector<1x1x32xf32> to vector<1x32xf32>
    %c0_28 = arith.constant 0 : index
    %c3 = arith.constant 3 : index
    %c0_29 = arith.constant 0 : index
    %25 = vector.load %arg7[%c0_28, %c3, %c0_29] : memref<3x4x32xf32, #tpu.memory_space<vmem>>, vector<1x1x32xf32>
    %26 = vector.shape_cast %25 : vector<1x1x32xf32> to vector<1x32xf32>
    %27 = arith.truncf %2 : vector<8x32xf32> to vector<8x32xbf16>
    %cst_30 = arith.constant dense<0.000000e+00> : vector<8x40xf32>
    %28 = tpu.matmul %27, %8, %cst_30 {dimension_numbers = #tpu.dot_dimension_numbers<[1], [0], [0], [1], [0, 0, 1, 1], [], []>} : vector<8x32xbf16>, vector<32x40xbf16>, vector<8x40xf32> -> vector<8x40xf32>
    %29 = vector.extract_strided_slice %28 {offsets = [0, 0], sizes = [8, 32], strides = [1, 1]} : vector<8x40xf32> to vector<8x32xf32>
    %30 = vector.broadcast %20 : vector<1x32xf32> to vector<8x32xf32>
    %31 = arith.addf %29, %30 : vector<8x32xf32>
    %cst_31 = arith.constant 2.000000e-01 : f32
    %32 = vector.broadcast %cst_31 : f32 to vector<8x32xf32>
    %33 = arith.mulf %32, %31 : vector<8x32xf32>
    %34 = arith.maximumf %31, %33 : vector<8x32xf32>
    %35 = vector.extract_strided_slice %28 {offsets = [0, 32], sizes = [8, 8], strides = [1, 1]} : vector<8x40xf32> to vector<8x8xf32>
    %36 = vector.broadcast %22 : vector<1x8xf32> to vector<8x8xf32>
    %37 = arith.addf %35, %36 : vector<8x8xf32>
    %38 = arith.truncf %6 : vector<24x16xf32> to vector<24x16xbf16>
    %cst_32 = arith.constant dense<0.000000e+00> : vector<24x24xf32>
    %39 = tpu.matmul %38, %14, %cst_32 {dimension_numbers = #tpu.dot_dimension_numbers<[1], [0], [0], [1], [0, 0, 1, 1], [], []>} : vector<24x16xbf16>, vector<16x24xbf16>, vector<24x24xf32> -> vector<24x24xf32>
    %40 = vector.extract_strided_slice %39 {offsets = [0, 0], sizes = [24, 16], strides = [1, 1]} : vector<24x24xf32> to vector<24x16xf32>
    %41 = vector.shape_cast %40 : vector<24x16xf32> to vector<3x8x16xf32>
    %42 = arith.mulf %41, %41 : vector<3x8x16xf32>
    %cst_33 = arith.constant dense<0.000000e+00> : vector<8x16xf32>
    %43 = vector.multi_reduction <add>, %42, %cst_33 [0] : vector<3x8x16xf32> to vector<8x16xf32>
    %44 = math.sqrt %43 : vector<8x16xf32>
    %cst_34 = arith.constant 0.000000e+00 : f32
    %45 = vector.broadcast %cst_34 : f32 to vector<8x16xf32>
    %46 = arith.subf %45, %44 : vector<8x16xf32>
    %47 = math.exp %46 : vector<8x16xf32>
    %cst_35 = arith.constant 1.000000e+00 : f32
    %48 = vector.broadcast %cst_35 : f32 to vector<8x16xf32>
    %49 = arith.addf %48, %47 : vector<8x16xf32>
    %cst_36 = arith.constant 1.000000e+00 : f32
    %50 = vector.broadcast %cst_36 : f32 to vector<8x16xf32>
    %51 = arith.divf %50, %49 : vector<8x16xf32>
    %52 = vector.shape_cast %51 : vector<8x16xf32> to vector<1x8x16xf32>
    %53 = vector.broadcast %52 : vector<1x8x16xf32> to vector<3x8x16xf32>
    %54 = arith.mulf %41, %53 : vector<3x8x16xf32>
    %55 = vector.shape_cast %54 : vector<3x8x16xf32> to vector<24x16xf32>
    %56 = vector.extract_strided_slice %39 {offsets = [0, 16], sizes = [24, 8], strides = [1, 1]} : vector<24x24xf32> to vector<24x8xf32>
    %57 = vector.shape_cast %56 : vector<24x8xf32> to vector<3x8x8xf32>
    %58 = arith.truncf %34 : vector<8x32xf32> to vector<8x32xbf16>
    %cst_37 = arith.constant dense<0.000000e+00> : vector<8x32xf32>
    %59 = tpu.matmul %58, %10, %cst_37 {dimension_numbers = #tpu.dot_dimension_numbers<[1], [0], [0], [1], [0, 0, 1, 1], [], []>} : vector<8x32xbf16>, vector<32x32xbf16>, vector<8x32xf32> -> vector<8x32xf32>
    %60 = vector.broadcast %24 : vector<1x32xf32> to vector<8x32xf32>
    %61 = arith.addf %59, %60 : vector<8x32xf32>
    %cst_38 = arith.constant 2.000000e-01 : f32
    %62 = vector.broadcast %cst_38 : f32 to vector<8x32xf32>
    %63 = arith.mulf %62, %61 : vector<8x32xf32>
    %64 = arith.maximumf %61, %63 : vector<8x32xf32>
    %65 = arith.truncf %55 : vector<24x16xf32> to vector<24x16xbf16>
    %cst_39 = arith.constant dense<0.000000e+00> : vector<24x16xf32>
    %66 = tpu.matmul %65, %16, %cst_39 {dimension_numbers = #tpu.dot_dimension_numbers<[1], [0], [0], [1], [0, 0, 1, 1], [], []>} : vector<24x16xbf16>, vector<16x16xbf16>, vector<24x16xf32> -> vector<24x16xf32>
    %67 = vector.shape_cast %66 : vector<24x16xf32> to vector<3x8x16xf32>
    %68 = arith.mulf %67, %67 : vector<3x8x16xf32>
    %cst_40 = arith.constant dense<0.000000e+00> : vector<8x16xf32>
    %69 = vector.multi_reduction <add>, %68, %cst_40 [0] : vector<3x8x16xf32> to vector<8x16xf32>
    %70 = math.sqrt %69 : vector<8x16xf32>
    %cst_41 = arith.constant 0.000000e+00 : f32
    %71 = vector.broadcast %cst_41 : f32 to vector<8x16xf32>
    %72 = arith.subf %71, %70 : vector<8x16xf32>
    %73 = math.exp %72 : vector<8x16xf32>
    %cst_42 = arith.constant 1.000000e+00 : f32
    %74 = vector.broadcast %cst_42 : f32 to vector<8x16xf32>
    %75 = arith.addf %74, %73 : vector<8x16xf32>
    %cst_43 = arith.constant 1.000000e+00 : f32
    %76 = vector.broadcast %cst_43 : f32 to vector<8x16xf32>
    %77 = arith.divf %76, %75 : vector<8x16xf32>
    %78 = vector.shape_cast %77 : vector<8x16xf32> to vector<1x8x16xf32>
    %79 = vector.broadcast %78 : vector<1x8x16xf32> to vector<3x8x16xf32>
    %80 = arith.mulf %67, %79 : vector<3x8x16xf32>
    %81 = vector.shape_cast %80 : vector<3x8x16xf32> to vector<24x16xf32>
    %82 = arith.mulf %57, %57 : vector<3x8x8xf32>
    %cst_44 = arith.constant dense<0.000000e+00> : vector<8x8xf32>
    %83 = vector.multi_reduction <add>, %82, %cst_44 [0] : vector<3x8x8xf32> to vector<8x8xf32>
    %84 = vector.shape_cast %37 : vector<8x8xf32> to vector<1x8x8xf32>
    %85 = vector.broadcast %84 : vector<1x8x8xf32> to vector<3x8x8xf32>
    %86 = arith.mulf %57, %85 : vector<3x8x8xf32>
    %87 = vector.shape_cast %86 : vector<3x8x8xf32> to vector<24x8xf32>
    %88 = arith.mulf %37, %83 : vector<8x8xf32>
    %89 = tpu.concatenate %64, %88 in 1 : vector<8x32xf32>, vector<8x8xf32> -> vector<8x40xf32>
    %90 = arith.truncf %89 : vector<8x40xf32> to vector<8x40xbf16>
    %cst_45 = arith.constant dense<0.000000e+00> : vector<8x32xf32>
    %91 = tpu.matmul %90, %12, %cst_45 {dimension_numbers = #tpu.dot_dimension_numbers<[1], [0], [0], [1], [0, 0, 1, 1], [], []>} : vector<8x40xbf16>, vector<40x32xbf16>, vector<8x32xf32> -> vector<8x32xf32>
    %92 = vector.broadcast %26 : vector<1x32xf32> to vector<8x32xf32>
    %93 = arith.addf %91, %92 : vector<8x32xf32>
    %94 = tpu.concatenate %81, %87 in 1 : vector<24x16xf32>, vector<24x8xf32> -> vector<24x24xf32>
    %95 = arith.truncf %94 : vector<24x24xf32> to vector<24x24xbf16>
    %cst_46 = arith.constant dense<0.000000e+00> : vector<24x16xf32>
    %96 = tpu.matmul %95, %18, %cst_46 {dimension_numbers = #tpu.dot_dimension_numbers<[1], [0], [0], [1], [0, 0, 1, 1], [], []>} : vector<24x24xbf16>, vector<24x16xbf16>, vector<24x16xf32> -> vector<24x16xf32>
    %cst_47 = arith.constant 5.000000e-01 : f32
    %97 = vector.broadcast %cst_47 : f32 to vector<8x32xf32>
    %98 = arith.mulf %93, %97 : vector<8x32xf32>
    %99 = arith.addf %2, %98 : vector<8x32xf32>
    %cst_48 = arith.constant 5.000000e-02 : f32
    %100 = vector.broadcast %cst_48 : f32 to vector<24x16xf32>
    %101 = arith.mulf %96, %100 : vector<24x16xf32>
    %102 = arith.addf %6, %101 : vector<24x16xf32>
    %c1_49 = arith.constant 1 : index
    %c0_50 = arith.constant 0 : index
    %c0_51 = arith.constant 0 : index
    %103 = vector.load %arg3[%c1_49, %c0_50, %c0_51] : memref<3x32x40xbf16, #tpu.memory_space<vmem>>, vector<1x32x40xbf16>
    %104 = vector.shape_cast %103 : vector<1x32x40xbf16> to vector<32x40xbf16>
    %c1_52 = arith.constant 1 : index
    %c0_53 = arith.constant 0 : index
    %c0_54 = arith.constant 0 : index
    %105 = vector.load %arg4[%c1_52, %c0_53, %c0_54] : memref<3x72x32xbf16, #tpu.memory_space<vmem>>, vector<1x32x32xbf16>
    %106 = vector.shape_cast %105 : vector<1x32x32xbf16> to vector<32x32xbf16>
    %c1_55 = arith.constant 1 : index
    %c32_56 = arith.constant 32 : index
    %c0_57 = arith.constant 0 : index
    %107 = vector.load %arg4[%c1_55, %c32_56, %c0_57] : memref<3x72x32xbf16, #tpu.memory_space<vmem>>, vector<1x40x32xbf16>
    %108 = vector.shape_cast %107 : vector<1x40x32xbf16> to vector<40x32xbf16>
    %c1_58 = arith.constant 1 : index
    %c0_59 = arith.constant 0 : index
    %c0_60 = arith.constant 0 : index
    %109 = vector.load %arg5[%c1_58, %c0_59, %c0_60] : memref<3x16x24xbf16, #tpu.memory_space<vmem>>, vector<1x16x24xbf16>
    %110 = vector.shape_cast %109 : vector<1x16x24xbf16> to vector<16x24xbf16>
    %c1_61 = arith.constant 1 : index
    %c0_62 = arith.constant 0 : index
    %c0_63 = arith.constant 0 : index
    %111 = vector.load %arg6[%c1_61, %c0_62, %c0_63] : memref<3x40x16xbf16, #tpu.memory_space<vmem>>, vector<1x16x16xbf16>
    %112 = vector.shape_cast %111 : vector<1x16x16xbf16> to vector<16x16xbf16>
    %c1_64 = arith.constant 1 : index
    %c16_65 = arith.constant 16 : index
    %c0_66 = arith.constant 0 : index
    %113 = vector.load %arg6[%c1_64, %c16_65, %c0_66] : memref<3x40x16xbf16, #tpu.memory_space<vmem>>, vector<1x24x16xbf16>
    %114 = vector.shape_cast %113 : vector<1x24x16xbf16> to vector<24x16xbf16>
    %c1_67 = arith.constant 1 : index
    %c0_68 = arith.constant 0 : index
    %c0_69 = arith.constant 0 : index
    %115 = vector.load %arg7[%c1_67, %c0_68, %c0_69] : memref<3x4x32xf32, #tpu.memory_space<vmem>>, vector<1x1x32xf32>
    %116 = vector.shape_cast %115 : vector<1x1x32xf32> to vector<1x32xf32>
    %c1_70 = arith.constant 1 : index
    %c1_71 = arith.constant 1 : index
    %c0_72 = arith.constant 0 : index
    %117 = vector.load %arg7[%c1_70, %c1_71, %c0_72] : memref<3x4x32xf32, #tpu.memory_space<vmem>>, vector<1x1x8xf32>
    %118 = vector.shape_cast %117 : vector<1x1x8xf32> to vector<1x8xf32>
    %c1_73 = arith.constant 1 : index
    %c2_74 = arith.constant 2 : index
    %c0_75 = arith.constant 0 : index
    %119 = vector.load %arg7[%c1_73, %c2_74, %c0_75] : memref<3x4x32xf32, #tpu.memory_space<vmem>>, vector<1x1x32xf32>
    %120 = vector.shape_cast %119 : vector<1x1x32xf32> to vector<1x32xf32>
    %c1_76 = arith.constant 1 : index
    %c3_77 = arith.constant 3 : index
    %c0_78 = arith.constant 0 : index
    %121 = vector.load %arg7[%c1_76, %c3_77, %c0_78] : memref<3x4x32xf32, #tpu.memory_space<vmem>>, vector<1x1x32xf32>
    %122 = vector.shape_cast %121 : vector<1x1x32xf32> to vector<1x32xf32>
    %123 = arith.truncf %99 : vector<8x32xf32> to vector<8x32xbf16>
    %cst_79 = arith.constant dense<0.000000e+00> : vector<8x40xf32>
    %124 = tpu.matmul %123, %104, %cst_79 {dimension_numbers = #tpu.dot_dimension_numbers<[1], [0], [0], [1], [0, 0, 1, 1], [], []>} : vector<8x32xbf16>, vector<32x40xbf16>, vector<8x40xf32> -> vector<8x40xf32>
    %125 = vector.extract_strided_slice %124 {offsets = [0, 0], sizes = [8, 32], strides = [1, 1]} : vector<8x40xf32> to vector<8x32xf32>
    %126 = vector.broadcast %116 : vector<1x32xf32> to vector<8x32xf32>
    %127 = arith.addf %125, %126 : vector<8x32xf32>
    %cst_80 = arith.constant 2.000000e-01 : f32
    %128 = vector.broadcast %cst_80 : f32 to vector<8x32xf32>
    %129 = arith.mulf %128, %127 : vector<8x32xf32>
    %130 = arith.maximumf %127, %129 : vector<8x32xf32>
    %131 = vector.extract_strided_slice %124 {offsets = [0, 32], sizes = [8, 8], strides = [1, 1]} : vector<8x40xf32> to vector<8x8xf32>
    %132 = vector.broadcast %118 : vector<1x8xf32> to vector<8x8xf32>
    %133 = arith.addf %131, %132 : vector<8x8xf32>
    %134 = arith.truncf %102 : vector<24x16xf32> to vector<24x16xbf16>
    %cst_81 = arith.constant dense<0.000000e+00> : vector<24x24xf32>
    %135 = tpu.matmul %134, %110, %cst_81 {dimension_numbers = #tpu.dot_dimension_numbers<[1], [0], [0], [1], [0, 0, 1, 1], [], []>} : vector<24x16xbf16>, vector<16x24xbf16>, vector<24x24xf32> -> vector<24x24xf32>
    %136 = vector.extract_strided_slice %135 {offsets = [0, 0], sizes = [24, 16], strides = [1, 1]} : vector<24x24xf32> to vector<24x16xf32>
    %137 = vector.shape_cast %136 : vector<24x16xf32> to vector<3x8x16xf32>
    %138 = arith.mulf %137, %137 : vector<3x8x16xf32>
    %cst_82 = arith.constant dense<0.000000e+00> : vector<8x16xf32>
    %139 = vector.multi_reduction <add>, %138, %cst_82 [0] : vector<3x8x16xf32> to vector<8x16xf32>
    %140 = math.sqrt %139 : vector<8x16xf32>
    %cst_83 = arith.constant 0.000000e+00 : f32
    %141 = vector.broadcast %cst_83 : f32 to vector<8x16xf32>
    %142 = arith.subf %141, %140 : vector<8x16xf32>
    %143 = math.exp %142 : vector<8x16xf32>
    %cst_84 = arith.constant 1.000000e+00 : f32
    %144 = vector.broadcast %cst_84 : f32 to vector<8x16xf32>
    %145 = arith.addf %144, %143 : vector<8x16xf32>
    %cst_85 = arith.constant 1.000000e+00 : f32
    %146 = vector.broadcast %cst_85 : f32 to vector<8x16xf32>
    %147 = arith.divf %146, %145 : vector<8x16xf32>
    %148 = vector.shape_cast %147 : vector<8x16xf32> to vector<1x8x16xf32>
    %149 = vector.broadcast %148 : vector<1x8x16xf32> to vector<3x8x16xf32>
    %150 = arith.mulf %137, %149 : vector<3x8x16xf32>
    %151 = vector.shape_cast %150 : vector<3x8x16xf32> to vector<24x16xf32>
    %152 = vector.extract_strided_slice %135 {offsets = [0, 16], sizes = [24, 8], strides = [1, 1]} : vector<24x24xf32> to vector<24x8xf32>
    %153 = vector.shape_cast %152 : vector<24x8xf32> to vector<3x8x8xf32>
    %154 = arith.truncf %130 : vector<8x32xf32> to vector<8x32xbf16>
    %cst_86 = arith.constant dense<0.000000e+00> : vector<8x32xf32>
    %155 = tpu.matmul %154, %106, %cst_86 {dimension_numbers = #tpu.dot_dimension_numbers<[1], [0], [0], [1], [0, 0, 1, 1], [], []>} : vector<8x32xbf16>, vector<32x32xbf16>, vector<8x32xf32> -> vector<8x32xf32>
    %156 = vector.broadcast %120 : vector<1x32xf32> to vector<8x32xf32>
    %157 = arith.addf %155, %156 : vector<8x32xf32>
    %cst_87 = arith.constant 2.000000e-01 : f32
    %158 = vector.broadcast %cst_87 : f32 to vector<8x32xf32>
    %159 = arith.mulf %158, %157 : vector<8x32xf32>
    %160 = arith.maximumf %157, %159 : vector<8x32xf32>
    %161 = arith.truncf %151 : vector<24x16xf32> to vector<24x16xbf16>
    %cst_88 = arith.constant dense<0.000000e+00> : vector<24x16xf32>
    %162 = tpu.matmul %161, %112, %cst_88 {dimension_numbers = #tpu.dot_dimension_numbers<[1], [0], [0], [1], [0, 0, 1, 1], [], []>} : vector<24x16xbf16>, vector<16x16xbf16>, vector<24x16xf32> -> vector<24x16xf32>
    %163 = vector.shape_cast %162 : vector<24x16xf32> to vector<3x8x16xf32>
    %164 = arith.mulf %163, %163 : vector<3x8x16xf32>
    %cst_89 = arith.constant dense<0.000000e+00> : vector<8x16xf32>
    %165 = vector.multi_reduction <add>, %164, %cst_89 [0] : vector<3x8x16xf32> to vector<8x16xf32>
    %166 = math.sqrt %165 : vector<8x16xf32>
    %cst_90 = arith.constant 0.000000e+00 : f32
    %167 = vector.broadcast %cst_90 : f32 to vector<8x16xf32>
    %168 = arith.subf %167, %166 : vector<8x16xf32>
    %169 = math.exp %168 : vector<8x16xf32>
    %cst_91 = arith.constant 1.000000e+00 : f32
    %170 = vector.broadcast %cst_91 : f32 to vector<8x16xf32>
    %171 = arith.addf %170, %169 : vector<8x16xf32>
    %cst_92 = arith.constant 1.000000e+00 : f32
    %172 = vector.broadcast %cst_92 : f32 to vector<8x16xf32>
    %173 = arith.divf %172, %171 : vector<8x16xf32>
    %174 = vector.shape_cast %173 : vector<8x16xf32> to vector<1x8x16xf32>
    %175 = vector.broadcast %174 : vector<1x8x16xf32> to vector<3x8x16xf32>
    %176 = arith.mulf %163, %175 : vector<3x8x16xf32>
    %177 = vector.shape_cast %176 : vector<3x8x16xf32> to vector<24x16xf32>
    %178 = arith.mulf %153, %153 : vector<3x8x8xf32>
    %cst_93 = arith.constant dense<0.000000e+00> : vector<8x8xf32>
    %179 = vector.multi_reduction <add>, %178, %cst_93 [0] : vector<3x8x8xf32> to vector<8x8xf32>
    %180 = vector.shape_cast %133 : vector<8x8xf32> to vector<1x8x8xf32>
    %181 = vector.broadcast %180 : vector<1x8x8xf32> to vector<3x8x8xf32>
    %182 = arith.mulf %153, %181 : vector<3x8x8xf32>
    %183 = vector.shape_cast %182 : vector<3x8x8xf32> to vector<24x8xf32>
    %184 = arith.mulf %133, %179 : vector<8x8xf32>
    %185 = tpu.concatenate %160, %184 in 1 : vector<8x32xf32>, vector<8x8xf32> -> vector<8x40xf32>
    %186 = arith.truncf %185 : vector<8x40xf32> to vector<8x40xbf16>
    %cst_94 = arith.constant dense<0.000000e+00> : vector<8x32xf32>
    %187 = tpu.matmul %186, %108, %cst_94 {dimension_numbers = #tpu.dot_dimension_numbers<[1], [0], [0], [1], [0, 0, 1, 1], [], []>} : vector<8x40xbf16>, vector<40x32xbf16>, vector<8x32xf32> -> vector<8x32xf32>
    %188 = vector.broadcast %122 : vector<1x32xf32> to vector<8x32xf32>
    %189 = arith.addf %187, %188 : vector<8x32xf32>
    %190 = tpu.concatenate %177, %183 in 1 : vector<24x16xf32>, vector<24x8xf32> -> vector<24x24xf32>
    %191 = arith.truncf %190 : vector<24x24xf32> to vector<24x24xbf16>
    %cst_95 = arith.constant dense<0.000000e+00> : vector<24x16xf32>
    %192 = tpu.matmul %191, %114, %cst_95 {dimension_numbers = #tpu.dot_dimension_numbers<[1], [0], [0], [1], [0, 0, 1, 1], [], []>} : vector<24x24xbf16>, vector<24x16xbf16>, vector<24x16xf32> -> vector<24x16xf32>
    %cst_96 = arith.constant 5.000000e-01 : f32
    %193 = vector.broadcast %cst_96 : f32 to vector<8x32xf32>
    %194 = arith.mulf %189, %193 : vector<8x32xf32>
    %195 = arith.addf %99, %194 : vector<8x32xf32>
    %cst_97 = arith.constant 5.000000e-02 : f32
    %196 = vector.broadcast %cst_97 : f32 to vector<24x16xf32>
    %197 = arith.mulf %192, %196 : vector<24x16xf32>
    %198 = arith.addf %102, %197 : vector<24x16xf32>
    %c2_98 = arith.constant 2 : index
    %c0_99 = arith.constant 0 : index
    %c0_100 = arith.constant 0 : index
    %199 = vector.load %arg3[%c2_98, %c0_99, %c0_100] : memref<3x32x40xbf16, #tpu.memory_space<vmem>>, vector<1x32x40xbf16>
    %200 = vector.shape_cast %199 : vector<1x32x40xbf16> to vector<32x40xbf16>
    %c2_101 = arith.constant 2 : index
    %c0_102 = arith.constant 0 : index
    %c0_103 = arith.constant 0 : index
    %201 = vector.load %arg4[%c2_101, %c0_102, %c0_103] : memref<3x72x32xbf16, #tpu.memory_space<vmem>>, vector<1x32x32xbf16>
    %202 = vector.shape_cast %201 : vector<1x32x32xbf16> to vector<32x32xbf16>
    %c2_104 = arith.constant 2 : index
    %c32_105 = arith.constant 32 : index
    %c0_106 = arith.constant 0 : index
    %203 = vector.load %arg4[%c2_104, %c32_105, %c0_106] : memref<3x72x32xbf16, #tpu.memory_space<vmem>>, vector<1x40x32xbf16>
    %204 = vector.shape_cast %203 : vector<1x40x32xbf16> to vector<40x32xbf16>
    %c2_107 = arith.constant 2 : index
    %c0_108 = arith.constant 0 : index
    %c0_109 = arith.constant 0 : index
    %205 = vector.load %arg5[%c2_107, %c0_108, %c0_109] : memref<3x16x24xbf16, #tpu.memory_space<vmem>>, vector<1x16x24xbf16>
    %206 = vector.shape_cast %205 : vector<1x16x24xbf16> to vector<16x24xbf16>
    %c2_110 = arith.constant 2 : index
    %c0_111 = arith.constant 0 : index
    %c0_112 = arith.constant 0 : index
    %207 = vector.load %arg6[%c2_110, %c0_111, %c0_112] : memref<3x40x16xbf16, #tpu.memory_space<vmem>>, vector<1x16x16xbf16>
    %208 = vector.shape_cast %207 : vector<1x16x16xbf16> to vector<16x16xbf16>
    %c2_113 = arith.constant 2 : index
    %c16_114 = arith.constant 16 : index
    %c0_115 = arith.constant 0 : index
    %209 = vector.load %arg6[%c2_113, %c16_114, %c0_115] : memref<3x40x16xbf16, #tpu.memory_space<vmem>>, vector<1x24x16xbf16>
    %210 = vector.shape_cast %209 : vector<1x24x16xbf16> to vector<24x16xbf16>
    %c2_116 = arith.constant 2 : index
    %c0_117 = arith.constant 0 : index
    %c0_118 = arith.constant 0 : index
    %211 = vector.load %arg7[%c2_116, %c0_117, %c0_118] : memref<3x4x32xf32, #tpu.memory_space<vmem>>, vector<1x1x32xf32>
    %212 = vector.shape_cast %211 : vector<1x1x32xf32> to vector<1x32xf32>
    %c2_119 = arith.constant 2 : index
    %c1_120 = arith.constant 1 : index
    %c0_121 = arith.constant 0 : index
    %213 = vector.load %arg7[%c2_119, %c1_120, %c0_121] : memref<3x4x32xf32, #tpu.memory_space<vmem>>, vector<1x1x8xf32>
    %214 = vector.shape_cast %213 : vector<1x1x8xf32> to vector<1x8xf32>
    %c2_122 = arith.constant 2 : index
    %c2_123 = arith.constant 2 : index
    %c0_124 = arith.constant 0 : index
    %215 = vector.load %arg7[%c2_122, %c2_123, %c0_124] : memref<3x4x32xf32, #tpu.memory_space<vmem>>, vector<1x1x32xf32>
    %216 = vector.shape_cast %215 : vector<1x1x32xf32> to vector<1x32xf32>
    %c2_125 = arith.constant 2 : index
    %c3_126 = arith.constant 3 : index
    %c0_127 = arith.constant 0 : index
    %217 = vector.load %arg7[%c2_125, %c3_126, %c0_127] : memref<3x4x32xf32, #tpu.memory_space<vmem>>, vector<1x1x32xf32>
    %218 = vector.shape_cast %217 : vector<1x1x32xf32> to vector<1x32xf32>
    %219 = arith.truncf %195 : vector<8x32xf32> to vector<8x32xbf16>
    %cst_128 = arith.constant dense<0.000000e+00> : vector<8x40xf32>
    %220 = tpu.matmul %219, %200, %cst_128 {dimension_numbers = #tpu.dot_dimension_numbers<[1], [0], [0], [1], [0, 0, 1, 1], [], []>} : vector<8x32xbf16>, vector<32x40xbf16>, vector<8x40xf32> -> vector<8x40xf32>
    %221 = vector.extract_strided_slice %220 {offsets = [0, 0], sizes = [8, 32], strides = [1, 1]} : vector<8x40xf32> to vector<8x32xf32>
    %222 = vector.broadcast %212 : vector<1x32xf32> to vector<8x32xf32>
    %223 = arith.addf %221, %222 : vector<8x32xf32>
    %cst_129 = arith.constant 2.000000e-01 : f32
    %224 = vector.broadcast %cst_129 : f32 to vector<8x32xf32>
    %225 = arith.mulf %224, %223 : vector<8x32xf32>
    %226 = arith.maximumf %223, %225 : vector<8x32xf32>
    %227 = vector.extract_strided_slice %220 {offsets = [0, 32], sizes = [8, 8], strides = [1, 1]} : vector<8x40xf32> to vector<8x8xf32>
    %228 = vector.broadcast %214 : vector<1x8xf32> to vector<8x8xf32>
    %229 = arith.addf %227, %228 : vector<8x8xf32>
    %230 = arith.truncf %198 : vector<24x16xf32> to vector<24x16xbf16>
    %cst_130 = arith.constant dense<0.000000e+00> : vector<24x24xf32>
    %231 = tpu.matmul %230, %206, %cst_130 {dimension_numbers = #tpu.dot_dimension_numbers<[1], [0], [0], [1], [0, 0, 1, 1], [], []>} : vector<24x16xbf16>, vector<16x24xbf16>, vector<24x24xf32> -> vector<24x24xf32>
    %232 = vector.extract_strided_slice %231 {offsets = [0, 0], sizes = [24, 16], strides = [1, 1]} : vector<24x24xf32> to vector<24x16xf32>
    %233 = vector.shape_cast %232 : vector<24x16xf32> to vector<3x8x16xf32>
    %234 = arith.mulf %233, %233 : vector<3x8x16xf32>
    %cst_131 = arith.constant dense<0.000000e+00> : vector<8x16xf32>
    %235 = vector.multi_reduction <add>, %234, %cst_131 [0] : vector<3x8x16xf32> to vector<8x16xf32>
    %236 = math.sqrt %235 : vector<8x16xf32>
    %cst_132 = arith.constant 0.000000e+00 : f32
    %237 = vector.broadcast %cst_132 : f32 to vector<8x16xf32>
    %238 = arith.subf %237, %236 : vector<8x16xf32>
    %239 = math.exp %238 : vector<8x16xf32>
    %cst_133 = arith.constant 1.000000e+00 : f32
    %240 = vector.broadcast %cst_133 : f32 to vector<8x16xf32>
    %241 = arith.addf %240, %239 : vector<8x16xf32>
    %cst_134 = arith.constant 1.000000e+00 : f32
    %242 = vector.broadcast %cst_134 : f32 to vector<8x16xf32>
    %243 = arith.divf %242, %241 : vector<8x16xf32>
    %244 = vector.shape_cast %243 : vector<8x16xf32> to vector<1x8x16xf32>
    %245 = vector.broadcast %244 : vector<1x8x16xf32> to vector<3x8x16xf32>
    %246 = arith.mulf %233, %245 : vector<3x8x16xf32>
    %247 = vector.shape_cast %246 : vector<3x8x16xf32> to vector<24x16xf32>
    %248 = vector.extract_strided_slice %231 {offsets = [0, 16], sizes = [24, 8], strides = [1, 1]} : vector<24x24xf32> to vector<24x8xf32>
    %249 = vector.shape_cast %248 : vector<24x8xf32> to vector<3x8x8xf32>
    %250 = arith.truncf %226 : vector<8x32xf32> to vector<8x32xbf16>
    %cst_135 = arith.constant dense<0.000000e+00> : vector<8x32xf32>
    %251 = tpu.matmul %250, %202, %cst_135 {dimension_numbers = #tpu.dot_dimension_numbers<[1], [0], [0], [1], [0, 0, 1, 1], [], []>} : vector<8x32xbf16>, vector<32x32xbf16>, vector<8x32xf32> -> vector<8x32xf32>
    %252 = vector.broadcast %216 : vector<1x32xf32> to vector<8x32xf32>
    %253 = arith.addf %251, %252 : vector<8x32xf32>
    %cst_136 = arith.constant 2.000000e-01 : f32
    %254 = vector.broadcast %cst_136 : f32 to vector<8x32xf32>
    %255 = arith.mulf %254, %253 : vector<8x32xf32>
    %256 = arith.maximumf %253, %255 : vector<8x32xf32>
    %257 = arith.truncf %247 : vector<24x16xf32> to vector<24x16xbf16>
    %cst_137 = arith.constant dense<0.000000e+00> : vector<24x16xf32>
    %258 = tpu.matmul %257, %208, %cst_137 {dimension_numbers = #tpu.dot_dimension_numbers<[1], [0], [0], [1], [0, 0, 1, 1], [], []>} : vector<24x16xbf16>, vector<16x16xbf16>, vector<24x16xf32> -> vector<24x16xf32>
    %259 = vector.shape_cast %258 : vector<24x16xf32> to vector<3x8x16xf32>
    %260 = arith.mulf %259, %259 : vector<3x8x16xf32>
    %cst_138 = arith.constant dense<0.000000e+00> : vector<8x16xf32>
    %261 = vector.multi_reduction <add>, %260, %cst_138 [0] : vector<3x8x16xf32> to vector<8x16xf32>
    %262 = math.sqrt %261 : vector<8x16xf32>
    %cst_139 = arith.constant 0.000000e+00 : f32
    %263 = vector.broadcast %cst_139 : f32 to vector<8x16xf32>
    %264 = arith.subf %263, %262 : vector<8x16xf32>
    %265 = math.exp %264 : vector<8x16xf32>
    %cst_140 = arith.constant 1.000000e+00 : f32
    %266 = vector.broadcast %cst_140 : f32 to vector<8x16xf32>
    %267 = arith.addf %266, %265 : vector<8x16xf32>
    %cst_141 = arith.constant 1.000000e+00 : f32
    %268 = vector.broadcast %cst_141 : f32 to vector<8x16xf32>
    %269 = arith.divf %268, %267 : vector<8x16xf32>
    %270 = vector.shape_cast %269 : vector<8x16xf32> to vector<1x8x16xf32>
    %271 = vector.broadcast %270 : vector<1x8x16xf32> to vector<3x8x16xf32>
    %272 = arith.mulf %259, %271 : vector<3x8x16xf32>
    %273 = vector.shape_cast %272 : vector<3x8x16xf32> to vector<24x16xf32>
    %274 = arith.mulf %249, %249 : vector<3x8x8xf32>
    %cst_142 = arith.constant dense<0.000000e+00> : vector<8x8xf32>
    %275 = vector.multi_reduction <add>, %274, %cst_142 [0] : vector<3x8x8xf32> to vector<8x8xf32>
    %276 = vector.shape_cast %229 : vector<8x8xf32> to vector<1x8x8xf32>
    %277 = vector.broadcast %276 : vector<1x8x8xf32> to vector<3x8x8xf32>
    %278 = arith.mulf %249, %277 : vector<3x8x8xf32>
    %279 = vector.shape_cast %278 : vector<3x8x8xf32> to vector<24x8xf32>
    %280 = arith.mulf %229, %275 : vector<8x8xf32>
    %281 = tpu.concatenate %256, %280 in 1 : vector<8x32xf32>, vector<8x8xf32> -> vector<8x40xf32>
    %282 = arith.truncf %281 : vector<8x40xf32> to vector<8x40xbf16>
    %cst_143 = arith.constant dense<0.000000e+00> : vector<8x32xf32>
    %283 = tpu.matmul %282, %204, %cst_143 {dimension_numbers = #tpu.dot_dimension_numbers<[1], [0], [0], [1], [0, 0, 1, 1], [], []>} : vector<8x40xbf16>, vector<40x32xbf16>, vector<8x32xf32> -> vector<8x32xf32>
    %284 = vector.broadcast %218 : vector<1x32xf32> to vector<8x32xf32>
    %285 = arith.addf %283, %284 : vector<8x32xf32>
    %286 = tpu.concatenate %273, %279 in 1 : vector<24x16xf32>, vector<24x8xf32> -> vector<24x24xf32>
    %287 = arith.truncf %286 : vector<24x24xf32> to vector<24x24xbf16>
    %cst_144 = arith.constant dense<0.000000e+00> : vector<24x16xf32>
    %288 = tpu.matmul %287, %210, %cst_144 {dimension_numbers = #tpu.dot_dimension_numbers<[1], [0], [0], [1], [0, 0, 1, 1], [], []>} : vector<24x24xbf16>, vector<24x16xbf16>, vector<24x16xf32> -> vector<24x16xf32>
    %cst_145 = arith.constant 5.000000e-01 : f32
    %289 = vector.broadcast %cst_145 : f32 to vector<8x32xf32>
    %290 = arith.mulf %285, %289 : vector<8x32xf32>
    %291 = arith.addf %195, %290 : vector<8x32xf32>
    %cst_146 = arith.constant 5.000000e-02 : f32
    %292 = vector.broadcast %cst_146 : f32 to vector<24x16xf32>
    %293 = arith.mulf %288, %292 : vector<24x16xf32>
    %294 = arith.addf %198, %293 : vector<24x16xf32>
    %295 = vector.shape_cast %294 : vector<24x16xf32> to vector<3x8x16xf32>
    %296 = arith.mulf %295, %295 : vector<3x8x16xf32>
    %cst_147 = arith.constant dense<0.000000e+00> : vector<8x16xf32>
    %297 = vector.multi_reduction <add>, %296, %cst_147 [0] : vector<3x8x16xf32> to vector<8x16xf32>
    %298 = math.sqrt %297 : vector<8x16xf32>
    %299 = tpu.concatenate %291, %298 in 1 : vector<8x32xf32>, vector<8x16xf32> -> vector<8x48xf32>
    %c0_148 = arith.constant 0 : index
    %c0_149 = arith.constant 0 : index
    %300 = vector.load %arg8[%c0_148, %c0_149] : memref<48x4xbf16, #tpu.memory_space<vmem>>, vector<48x4xbf16>
    %301 = arith.truncf %299 : vector<8x48xf32> to vector<8x48xbf16>
    %cst_150 = arith.constant dense<0.000000e+00> : vector<8x4xf32>
    %302 = tpu.matmul %301, %300, %cst_150 {dimension_numbers = #tpu.dot_dimension_numbers<[1], [0], [0], [1], [0, 0, 1, 1], [], []>} : vector<8x48xbf16>, vector<48x4xbf16>, vector<8x4xf32> -> vector<8x4xf32>
    %c0_151 = arith.constant 0 : index
    %c0_152 = arith.constant 0 : index
    %303 = vector.load %arg9[%c0_151, %c0_152] : memref<8x4xf32, #tpu.memory_space<vmem>>, vector<8x4xf32>
    tpu.vector_store %arg9[%c0_151, %c0_152], %302 {strides = array<i32>} : memref<8x4xf32, #tpu.memory_space<vmem>>, vector<8x4xf32>,
    return
  }
  func.func @transform_0(%arg0: i32) -> (i32, i32) {
    %c0_i32 = arith.constant 0 : i32
    %c0_i32_0 = arith.constant 0 : i32
    return %arg0, %c0_i32 : i32, i32
  }
  func.func @transform_1(%arg0: i32) -> (i32, i32, i32) {
    %c0_i32 = arith.constant 0 : i32
    %c0_i32_0 = arith.constant 0 : i32
    %c0_i32_1 = arith.constant 0 : i32
    return %c0_i32, %arg0, %c0_i32_0 : i32, i32, i32
  }
  func.func @transform_2(%arg0: i32) -> (i32, i32, i32) {
    %c0_i32 = arith.constant 0 : i32
    %c0_i32_0 = arith.constant 0 : i32
    %c0_i32_1 = arith.constant 0 : i32
    %c0_i32_2 = arith.constant 0 : i32
    return %c0_i32, %c0_i32_0, %c0_i32_1 : i32, i32, i32
  }
  func.func @transform_3(%arg0: i32) -> (i32, i32, i32) {
    %c0_i32 = arith.constant 0 : i32
    %c0_i32_0 = arith.constant 0 : i32
    %c0_i32_1 = arith.constant 0 : i32
    %c0_i32_2 = arith.constant 0 : i32
    return %c0_i32, %c0_i32_0, %c0_i32_1 : i32, i32, i32
  }
  func.func @transform_4(%arg0: i32) -> (i32, i32, i32) {
    %c0_i32 = arith.constant 0 : i32
    %c0_i32_0 = arith.constant 0 : i32
    %c0_i32_1 = arith.constant 0 : i32
    %c0_i32_2 = arith.constant 0 : i32
    return %c0_i32, %c0_i32_0, %c0_i32_1 : i32, i32, i32
  }
  func.func @transform_5(%arg0: i32) -> (i32, i32, i32) {
    %c0_i32 = arith.constant 0 : i32
    %c0_i32_0 = arith.constant 0 : i32
    %c0_i32_1 = arith.constant 0 : i32
    %c0_i32_2 = arith.constant 0 : i32
    return %c0_i32, %c0_i32_0, %c0_i32_1 : i32, i32, i32
  }
  func.func @transform_6(%arg0: i32) -> (i32, i32, i32) {
    %c0_i32 = arith.constant 0 : i32
    %c0_i32_0 = arith.constant 0 : i32
    %c0_i32_1 = arith.constant 0 : i32
    %c0_i32_2 = arith.constant 0 : i32
    return %c0_i32, %c0_i32_0, %c0_i32_1 : i32, i32, i32
  }
  func.func @transform_7(%arg0: i32) -> (i32, i32) {
    %c0_i32 = arith.constant 0 : i32
    %c0_i32_0 = arith.constant 0 : i32
    %c0_i32_1 = arith.constant 0 : i32
    return %c0_i32, %c0_i32_0 : i32, i32
  }
  func.func @transform_8(%arg0: i32) -> (i32, i32) {
    %c0_i32 = arith.constant 0 : i32
    %c0_i32_0 = arith.constant 0 : i32
    return %arg0, %c0_i32 : i32, i32
  }
}

</mosaic_0001>

<bundles_post_ra>
// kernel: tpu_custom_call.1
= control target key start
LH: loop header
LB: loop body
LE: loop exit
PB: predicated region body
PF: predicated region fallthrough
CT: control target
= control target key end

     0   :  { %s1955_s27 = smov 0   ;;  %s1957_s28 = smov 0   ;;  %s2408_s0 = inlined_call_operand.vmem [shape: f32[16,32], index: 0, kind: input, shape index: {}]   ;;  %s2409_s1 = inlined_call_operand.vmem [shape: f32[3,16,16], index: 1, kind: input, shape index: {}]   ;;  %s2410_s2 = inlined_call_operand.vmem [shape: bf16[3,32,40], index: 2, kind: input, shape index: {}]   ;;  %s2411_s3 = inlined_call_operand.vmem [shape: bf16[3,72,32], index: 3, kind: input, shape index: {}]   ;;  %s2412_s4 = inlined_call_operand.vmem [shape: bf16[3,16,24], index: 4, kind: input, shape index: {}]   ;;  %s2413_s5 = inlined_call_operand.vmem [shape: bf16[3,40,16], index: 5, kind: input, shape index: {}]   ;;  %s2414_s6 = inlined_call_operand.vmem [shape: f32[3,4,32], index: 6, kind: input, shape index: {}]   ;;  %s2415_s7 = inlined_call_operand.vmem [shape: bf16[48,4], index: 7, kind: input, shape index: {}]   ;;  %s2416_s8 = inlined_call_operand.vmem [shape: f32[16,4], index: 8, kind: output, shape index: {}]  }
   0x1   :  { %s1959_s29 = smov 0  }
   0x2 LB: > { %s1567_s30 = sadd.s32 4294967295, %s1905_s29   ;;  %s1972_s9 = sadd.s32 1, %s1905_s29   ;;  %s1905_s29 = sphi %s1959_s29, %s2419_s29   ;;  %s1901_s28 = sphi %s1957_s28, %s2418_s28   ;;  %s1897_s27 = sphi %s1955_s27, %s2417_s27  }
   0x3   : > { %s48_s10 = ssub.s32 %s1905_s29, %s1972_s9  ;;  %s51_s11 = sadd.s32 1, %s1901_s28 }
   0x4   : > { %p49_p0 = scmp.eq.s32.totalorder %s48_s10, 0  ;;  %p58_p1 = scmp.ne.s32.totalorder %s1901_s28, %s1897_s27 }
   0x5   : > { %p59_p2 = scmp.eq.s32.totalorder %s1905_s29, 0  ;;  %p1570_p4 = scmp.ge.s32.totalorder %s1905_s29, 2 }
   0x6   : > { %s1981_s12 = scalar_select %p49_p0, %s1901_s28, %s51_s11  }
   0x7   : > { %p60_p3 = por %p59_p2, %p58_p1  ;;  %254 = sbr.rel (%p1570_p4) target bundleno = 19 (0x13), region = 40 }
   0xc   : > { %264 = sbr.rel (!%p60_p3) target bundleno = 19 (0x13), region = 48  ;;  %s266_s13 = sand.u32 (%p60_p3), 1, %s1901_s28  }
   0xd   : > { %s1571_s14 = sshll.u32 (%p60_p3), %s1905_s29, 3  ;;  %s1804_s15 = smul.u32 (%p60_p3), 24, %s266_s13 }
   0xe   : > { %s270_s18 = scalar_lea.vmem (%p60_p3), %s2409_s1, %s1571_s14 }
   0xf   : > { %v303_v0 = vld [vmem:[%s270_s18] sm:$0xff] (%p60_p3)  ;;  %v305_v1 = vld [vmem:[%s270_s18 + $0x10] sm:$0xff] (%p60_p3)  ;;  %s268_s19 = scalar_lea.vmem (%p60_p3), [#allocation2], %s1804_s15 }
  0x10   : > { %v307_v2 = vld [vmem:[%s270_s18 + $0x20] sm:$0xff] (%p60_p3)  ;;  %304 = vst [vmem:[%s268_s19] sm:$0xff] (%p60_p3), %v303_v0 }
  0x11   : > { %306 = vst [vmem:[%s268_s19 + $0x8] sm:$0xff] %v305_v1 }
  0x12   : > { %308 = vst [vmem:[%s268_s19 + $0x10] sm:$0xff] %v307_v2 }
  0x13 PF: > { %p1572_p5 = scmp.ge.s32.totalorder %s1905_s29, 1  ;;  %p313_p6 = scmp.lt.s32.totalorder %s1905_s29, 3 }
  0x15   : > { %p314_p7 = pnand %p1572_p5, %p313_p6 }
  0x16   : > { %s320_s24 = sand.u32 (!%p314_p7), 1, %s1897_s27   ;;  %p356_p8 = scmp.lt.s32.totalorder (!%p314_p7), %s1567_s30, 1 }
  0x17   : > { %317 = sbr.rel (%p314_p7) target bundleno = 1979 (0x7bb), region = 86  ;;  %s1907_s15 = smov (!%p314_p7), 32  }
  0x18   : > { %s1805_s25 = smul.u32 (!%p314_p7), 24, %s320_s24  ;;  %s1908_s24 = smov (!%p314_p7), 112  }
  0x1a   : > { %s322_s27 = scalar_lea.vmem (!%p314_p7), [#allocation2], %s1805_s25  ;;  %s1909_s25 = smov (!%p314_p7), 16  }
  0x1c   : > { %v1774_v3 = vld [vmem:[%s2410_s2 + $0x8] sm:$0xff]  ;;  %v1779_v4 = vld [vmem:[%s2412_s4] sm:$0xff]  ;;  %s2421_s30 = smov (!%p356_p8, %s1567_s30), 1  ;;  %vm445_vm0 = vcmask 130048   ;;  %vm410_vm1 = vcmask 261120   ;;  %vm618_vm2 = vcmask 195712  }
  0x1d   : > { %v1833_v5 = vld [vmem:[%s2414_s6 + $0x1] ss:$0 sm:$0xff]  ;;  %420 = vmatpush.bf16.msra.mxu0 %v1774_v3  ;;  %459 = vmatpush.bf16.msra.mxu1 %v1779_v4  ;;  %v369_v9 = vld [vmem:[%s322_s27 + $0x10] sm:$0xff]  ;;  %s1573_s14 = sshll.u32 %s2421_s30, 3  ;;  %v1834_v20 = vld [vmem:[%s2414_s6] ss:$0 sm:$0xff] }
  0x1e   : > { %v1773_v6 = vld [vmem:[%s2410_s2] sm:$0xff]  ;;  %1803 = vmatpush.bf16.msra.mxu2 %v1779_v4  ;;  %433 = vrot.lane.b32.xlu0 %v1833_v5, %s1907_s15  ;;  %v2016_v12 = vmul.f32 0.00083333335, %v369_v9  ;;  %s359_s17 = scalar_lea.vmem %s2408_s0, %s1573_s14  ;;  %v1776_v18 = vld [vmem:[%s2411_s3 + $0x8] sm:$0xff]  ;;  %vm658_vm9 = vcmask 1043456   ;;  %vm654_vm10 = vcmask 326656  }
  0x1f   : > { %v367_v7 = vld [vmem:[%s322_s27] sm:$0xff]  ;;  %v368_v8 = vld [vmem:[%s322_s27 + $0x8] sm:$0xff] }
  0x20   : > { %v2012_v10 = vmul.f32 0.00083333335, %v367_v7  ;;  %v2014_v11 = vmul.f32 0.00083333335, %v368_v8  ;;  %v365_v13 = vld [vmem:[%s359_s17] sm:$0xff]  ;;  %v438_v15 = vpack.c.bf16 %v2016_v12, %v2016_v12 }
  0x21   : > { %421 = vmatpush.bf16.msra.mxu0 %v1773_v6  ;;  %v2027_v16 = vmul.f32 0.041666668, %v365_v13  ;;  %v1775_v19 = vld [vmem:[%s2411_s3] sm:$0xff] }
  0x22   : > { %v437_v14 = vpack.c.bf16 %v2014_v11, %v2012_v10  ;;  %1589 = vmatmul.msk.bf16.vlgmr.msra.gmra.mxu2 %vm445_vm0, %v438_v15  ;;  %v1780_v54 = vld [vmem:[%s2413_s5] sm:$0xff] }
  0x23   : > { %v397_v17 = vpack.c.bf16 %v2027_v16, %v2027_v16  ;;  %535 = vmatpush.bf16.msrb.mxu2 %v1776_v18  ;;  %565 = vmatpush.bf16.msra.mxu3 %v1780_v54  ;;  %v385_v15 = vld [vmem:[%s2411_s3 + $0x20] sm:$0xf] }
  0x24   : > { %1588 = vmatmul.msk.bf16.vlgmr.msra.gmra.mxu1 %vm445_vm0, %v437_v14 }
  0x25   : > { %1583 = vmatmul.msk.bf16.vlgmr.msra.gmra.mxu0 %vm410_vm1, %v397_v17  ;;  %v648_v17 = vunpack.c.l.b16 %v385_v15 }
  0x27   : > { %536 = vmatpush.bf16.msrb.mxu2 %v1775_v19  ;;  %v651_v18 = vpack.c.b16 %v648_v17, %v648_v17 }
  0x29   : > { %v660_v19 = vsel %vm658_vm9, %v651_v18, 0 }
  0x2a   : > { %667 = vmatpush.bf16.msrb.mxu0 %v660_v19 }
  0x90   : > { %v434_v22 = vpop.permute.xlu0 %433 }
  0xa1   : > { %v2043_v21 = vpop.f32.mrf.mxu1 }
  0xa2   : > { %v423_v23 = vpop.f32.mrf.mxu0  ;;  %v470_v27 = vmul.f32 %v2043_v21, %v2043_v21 }
  0xa3   : > { %v428_v24 = vadd.f32 %v1834_v20, %v423_v23  ;;  %v2045_v25 = vadd.f32 %v434_v22, %v423_v23  ;;  %v1778_v20 = vld [vmem:[%s2411_s3 + $0x18] sm:$0xff]  ;;  %v1777_v22 = vld [vmem:[%s2411_s3 + $0x10] sm:$0xff]  ;;  %v1835_v23 = vld [vmem:[%s2414_s6 + $0x2] ss:$0 sm:$0xff] }
  0xa4   : > { %v473_v34 = vsel %vm445_vm0, %v470_v27, 0.0  ;;  %v619_v35 = vsel %vm618_vm2, %v470_v27, 0.0  ;;  %668 = vmatpush.bf16.msrb.mxu0 %v1778_v20 }
  0xa5   : > { %v429_v26 = vmul.f32 0.2, %v428_v24  ;;  %625 = vrot.lane.b32.xlu0 %v2045_v25, %s1908_s24  ;;  %v2051_v28 = vpop.f32.mrf.mxu2 }
  0xa6   : > { %v472_v30 = vmul.f32 %v2051_v28, %v2051_v28 }
  0xa7   : > { %v430_v29 = vmax.f32 %v428_v24, %v429_v26 }
  0xa8   : > { %v476_v37 = vsel %vm445_vm0, %v472_v30, 0.0  ;;  %v622_v40 = vsel %vm618_vm2, %v472_v30, 0.0  ;;  %669 = vmatpush.bf16.msrb.mxu0 %v1777_v22  ;;  %v1836_v22 = vld [vmem:[%s2414_s6 + $0x3] ss:$0 sm:$0xff] }
  0xa9   : > { %v2055_v31 = vpop.f32.mrf.mxu1  ;;  %v512_v32 = vpack.c.bf16 %v430_v29, %v430_v29 }
  0xaa   : > { %v471_v33 = vmul.f32 %v2055_v31, %v2055_v31  ;;  %v425_v36 = vpop.f32.mrf.mxu0 }
  0xab   : > { %1598 = vmatmul.msk.bf16.vlgmr.msrb.gmra.mxu2 %vm410_vm1, %v512_v32 }
  0xac   : > { %v474_v38 = vsel %vm445_vm0, %v471_v33, 0.0  ;;  %v620_v39 = vsel %vm618_vm2, %v471_v33, 0.0 }
  0xad   : > { %v475_v41 = vadd.f32 %v474_v38, %v473_v34  ;;  %v621_v42 = vadd.f32 %v620_v39, %v619_v35  ;;  %v468_v44 = vpop.f32.mrf.mxu2 }
  0xaf   : > { %v477_v43 = vadd.f32 %v476_v37, %v475_v41  ;;  %v623_v45 = vadd.f32 %v622_v40, %v621_v42 }
  0xb1   : > { %1845 = vrsqrt.f32 %v477_v43  ;;  %632 = vrot.lane.b32.xlu1 %v623_v45, %s1909_s25  ;;  %vm485_vm3 = vcmp.eq.f32.partialorder %v477_v43, inf  ;;  %v488_v53 = vand.u32 2147483648, %v477_v43  ;;  %vm487_vm4 = vcmp.eq.f32.partialorder %v477_v43, 0.0 }
  0xb7   : > { %v1846_v46 = vpop.eup %1845 }
  0xb8   : > { %v479_v47 = vmul.f32 %v1846_v46, %v477_v43 }
  0xba   : > { %v480_v48 = vmul.f32 %v1846_v46, %v479_v47 }
  0xbc   : > { %v481_v49 = vmul.f32 0.5, %v480_v48 }
  0xbe   : > { %v482_v50 = vsub.f32 1.5, %v481_v49 }
  0xc0   : > { %v483_v51 = vmul.f32 %v1846_v46, %v482_v50 }
  0xc2   : > { %v484_v52 = vmul.f32 %v483_v51, %v477_v43  ;;  %v392_v51 = vld [vmem:[%s2413_s5 + $0x10] sm:$0xf] }
  0xc4   : > { %v486_v55 = vsel %vm485_vm3, %v477_v43, %v484_v52  ;;  %v685_v52 = vunpack.c.l.b16 %v392_v51 }
  0xc5   : > { %v489_v56 = vsel %vm487_vm4, %v488_v53, %v486_v55  ;;  %vm689_vm4 = vcmask 195584  }
  0xc6   : > { %v490_v57 = vsub.f32 0.0, %v489_v56  ;;  %v687_v54 = vpack.c.b16 %v685_v52, %v685_v52 }
  0xc8   : > { %v491_v58 = vmul.f32 1.442695, %v490_v57  ;;  %v697_v56 = vsel %vm658_vm9, %v687_v54, 0 }
  0xc9   : > { %705 = vmatpush.bf16.msra.mxu2 %v697_v56 }
  0xca   : > { %1847 = vpow2.f32 %v491_v58 }
  0xd0   : > { %v1848_v59 = vpop.eup %1847 }
  0xd1   : > { %v493_v60 = vadd.f32 1.0, %v1848_v59 }
  0xd3   : > { %1849 = vrcp.f32 %v493_v60  ;;  %v505_v0 = vand.u32 2147483648, %v493_v60  ;;  %v503_v2 = vand.u32 2147483647, %v493_v60  ;;  %vm499_vm6 = vweird.f32 %v493_v60 }
  0xd5   : > { %v506_v4 = vor.u32 1.1754944e-38, %v505_v0  ;;  %vm504_vm8 = vcmp.eq.f32.partialorder %v503_v2, 8.507059e+37 }
  0xd9   : > { %v1850_v61 = vpop.eup %1849 }
  0xda   : > { %v495_v62 = vmul.f32 %v1850_v61, %v493_v60  ;;  %vm500_vm5 = vweird.f32 %v1850_v61  ;;  %v1781_v60 = vld [vmem:[%s2413_s5 + $0x8] sm:$0xff] }
  0xdb   : > { %vm501_vm7 = vmor %vm499_vm6, %vm500_vm5  ;;  %706 = vmatpush.bf16.msra.mxu2 %v1781_v60 }
  0xdc   : > { %v496_v63 = vsub.f32 1.0, %v495_v62 }
  0xde   : > { %v497_v1 = vmul.f32 %v1850_v61, %v496_v63  ;;  %v1783_v63 = vld [vmem:[%s2410_s2 + $0x18] sm:$0xff] }
  0xdf   : > { %776 = vmatpush.bf16.msrb.mxu1 %v1783_v63 }
  0xe0   : > { %v498_v3 = vadd.f32 %v1850_v61, %v497_v1  ;;  %v1782_v1 = vld [vmem:[%s2410_s2 + $0x10] sm:$0xff] }
  0xe2   : > { %v502_v5 = vsel %vm501_vm7, %v1850_v61, %v498_v3 }
  0xe3   : > { %v507_v6 = vsel %vm504_vm8, %v506_v4, %v502_v5  ;;  %777 = vmatpush.bf16.msrb.mxu1 %v1782_v1  ;;  %v1837_v4 = vld [vmem:[%s2414_s6 + $0x5] ss:$0 sm:$0xff] }
  0xe4   : > { %v510_v7 = vmul.f32 %v507_v6, %v2055_v31  ;;  %v509_v8 = vmul.f32 %v507_v6, %v2043_v21  ;;  %v511_v13 = vmul.f32 %v507_v6, %v2051_v28  ;;  %v1788_v6 = vld [vmem:[%s2412_s4 + $0x8] sm:$0xff]  ;;  %789 = vrot.lane.b32.xlu1 %v1837_v4, %s1907_s15 }
  0xe5   : > { %814 = vmatpush.bf16.msrb.mxu3 %v1788_v6 }
  0xe6   : > { %v544_v9 = vpack.c.bf16 %v510_v7, %v509_v8  ;;  %v545_v14 = vpack.c.bf16 %v511_v13, %v511_v13 }
  0xe8   : > { %1603 = vmatmul.msk.bf16.vlgmr.msra.gmra.mxu3 %vm445_vm0, %v544_v9 }
  0xf8   : > { %1604 = vmatmul.msk.bf16.gmra.mxu3 %vm445_vm0, %v545_v14 }
 0x117   : > { %v626_v17 = vpop.permute.xlu0 %625 }
 0x123   : > { %v633_v27 = vpop.permute.xlu1 %632 }
 0x124   : > { %v635_v30 = vmul.f32 %v633_v27, %v2045_v25 }
 0x12e   : > { %v538_v24 = vpop.f32.mrf.mxu2 }
 0x12f   : > { %v539_v26 = vadd.f32 %v1835_v23, %v538_v24  ;;  %v628_v23 = vmul.f32 %v626_v17, %v2043_v21  ;;  %v629_v24 = vmul.f32 %v626_v17, %v2055_v31 }
 0x131   : > { %v542_v29 = vmul.f32 0.2, %v539_v26 }
 0x133   : > { %v543_v32 = vmax.f32 %v539_v26, %v542_v29 }
 0x135   : > { %v636_v33 = vsel %vm410_vm1, %v543_v32, %v635_v30 }
 0x136   : > { %v637_v34 = vpack.c.bf16 %v636_v33, %v636_v33  ;;  %v540_v35 = vpop.f32.mrf.mxu2 }
 0x138   : > { %1613 = vmatmul.msk.bf16.vlgmr.msrb.gmra.mxu0 %vm654_vm10, %v637_v34 }
 0x16b   : > { %v2091_v36 = vpop.f32.mrf.mxu3 }
 0x16c   : > { %v576_v39 = vmul.f32 %v2091_v36, %v2091_v36 }
 0x16e   : > { %v579_v41 = vsel %vm445_vm0, %v576_v39, 0.0 }
 0x173   : > { %v2093_v37 = vpop.f32.mrf.mxu3 }
 0x174   : > { %v577_v38 = vmul.f32 %v2093_v37, %v2093_v37 }
 0x176   : > { %v580_v25 = vsel %vm445_vm0, %v577_v38, 0.0 }
 0x177   : > { %v581_v43 = vadd.f32 %v580_v25, %v579_v41  ;;  %v1784_v41 = vld [vmem:[%s2411_s3 + $0x24] sm:$0xff] }
 0x17b   : > { %v2100_v40 = vpop.f32.mrf.mxu3 }
 0x17c   : > { %v578_v42 = vmul.f32 %v2100_v40, %v2100_v40 }
 0x17e   : > { %v582_v44 = vsel %vm445_vm0, %v578_v42, 0.0 }
 0x17f   : > { %v583_v45 = vadd.f32 %v582_v44, %v581_v43 }
 0x181   : > { %1851 = vrsqrt.f32 %v583_v45  ;;  %vm591_vm11 = vcmp.eq.f32.partialorder %v583_v45, inf  ;;  %v594_v58 = vand.u32 2147483648, %v583_v45  ;;  %vm593_vm12 = vcmp.eq.f32.partialorder %v583_v45, 0.0 }
 0x183   : > { %v574_v46 = vpop.f32.mrf.mxu3 }
 0x187   : > { %v1852_v47 = vpop.eup %1851 }
 0x188   : > { %v585_v48 = vmul.f32 %v1852_v47, %v583_v45 }
 0x18a   : > { %v586_v49 = vmul.f32 %v1852_v47, %v585_v48 }
 0x18c   : > { %v587_v50 = vmul.f32 0.5, %v586_v49 }
 0x18e   : > { %v588_v53 = vsub.f32 1.5, %v587_v50 }
 0x190   : > { %v589_v55 = vmul.f32 %v1852_v47, %v588_v53 }
 0x192   : > { %v590_v57 = vmul.f32 %v589_v55, %v583_v45 }
 0x194   : > { %v592_v59 = vsel %vm591_vm11, %v583_v45, %v590_v57 }
 0x195   : > { %v595_v61 = vsel %vm593_vm12, %v594_v58, %v592_v59 }
 0x196   : > { %v596_v62 = vsub.f32 0.0, %v595_v61 }
 0x198   : > { %v597_v0 = vmul.f32 1.442695, %v596_v62 }
 0x19a   : > { %1853 = vpow2.f32 %v597_v0 }
 0x1a0   : > { %v1854_v2 = vpop.eup %1853 }
 0x1a1   : > { %v599_v3 = vadd.f32 1.0, %v1854_v2 }
 0x1a3   : > { %1855 = vrcp.f32 %v599_v3  ;;  %v611_v9 = vand.u32 2147483648, %v599_v3  ;;  %v609_v14 = vand.u32 2147483647, %v599_v3  ;;  %vm605_vm14 = vweird.f32 %v599_v3 }
 0x1a5   : > { %v612_v18 = vor.u32 1.1754944e-38, %v611_v9  ;;  %vm610_vm3 = vcmp.eq.f32.partialorder %v609_v14, 8.507059e+37 }
 0x1a9   : > { %v1856_v5 = vpop.eup %1855 }
 0x1aa   : > { %v601_v7 = vmul.f32 %v1856_v5, %v599_v3  ;;  %vm606_vm13 = vweird.f32 %v1856_v5 }
 0x1ab   : > { %vm607_vm15 = vmor %vm605_vm14, %vm606_vm13 }
 0x1ac   : > { %v602_v8 = vsub.f32 1.0, %v601_v7 }
 0x1ae   : > { %v603_v13 = vmul.f32 %v1856_v5, %v602_v8 }
 0x1b0   : > { %v604_v15 = vadd.f32 %v1856_v5, %v603_v13 }
 0x1b2   : > { %v608_v19 = vsel %vm607_vm15, %v1856_v5, %v604_v15 }
 0x1b3   : > { %v613_v20 = vsel %vm610_vm3, %v612_v18, %v608_v19 }
 0x1b4   : > { %v615_v26 = vmul.f32 %v613_v20, %v2091_v36  ;;  %v616_v27 = vmul.f32 %v613_v20, %v2093_v37  ;;  %v617_v36 = vmul.f32 %v613_v20, %v2100_v40  ;;  %v630_v37 = vmul.f32 %v626_v17, %v2051_v28  ;;  %v1838_v40 = vld [vmem:[%s2414_s6 + $0x4] ss:$0 sm:$0xff]  ;;  %v790_v28 = vpop.permute.xlu1 %789 }
 0x1b5   : > { %v671_v32 = vpop.f32.mrf.mxu0 }
 0x1b6   : > { %v675_v29 = vsel %vm445_vm0, %v615_v26, %v628_v23  ;;  %v676_v30 = vsel %vm445_vm0, %v616_v27, %v629_v24  ;;  %v672_v34 = vadd.f32 %v1836_v22, %v671_v32  ;;  %v677_v39 = vsel %vm445_vm0, %v617_v36, %v630_v37  ;;  %v1789_v27 = vld [vmem:[%s2413_s5 + $0x14] sm:$0xff] }
 0x1b7   : > { %v678_v33 = vpack.c.bf16 %v676_v30, %v675_v29  ;;  %v679_v25 = vpack.c.bf16 %v677_v39, %v677_v39  ;;  %920 = vmatpush.bf16.msra.mxu1 %v1789_v27 }
 0x1b8   : > { %v717_v35 = vmul.f32 0.5, %v672_v34 }
 0x1b9   : > { %1618 = vmatmul.msk.bf16.vlgmr.msra.gmra.mxu2 %vm689_vm4, %v678_v33 }
 0x1ba   : > { %v2137_v38 = vadd.f32 %v717_v35, %v2027_v16  ;;  %v1785_v16 = vld [vmem:[%s2411_s3 + $0x2c] sm:$0xff] }
 0x1bb   : > { %890 = vmatpush.bf16.msra.mxu0 %v1785_v16 }
 0x1bc   : > { %v754_v21 = vpack.c.bf16 %v2137_v38, %v2137_v38 }
 0x1bd   : > { %v673_v31 = vpop.f32.mrf.mxu0 }
 0x1be   : > { %1652 = vmatmul.msk.bf16.vlgmr.msrb.gmra.mxu1 %vm410_vm1, %v754_v21  ;;  %v1632_v21 = vld [vmem:[%s2411_s3 + $0x44] sm:$0xf] }
 0x1bf   : > { %891 = vmatpush.bf16.msra.mxu0 %v1784_v41  ;;  %v1002_v36 = vunpack.c.l.b16 %v1632_v21 }
 0x1c1   : > { %v1005_v39 = vpack.c.b16 %v1002_v36, %v1002_v36 }
 0x1c3   : > { %v1012_v41 = vsel %vm658_vm9, %v1005_v39, 0 }
 0x1c4   : > { %1019 = vmatpush.bf16.msrb.mxu0 %v1012_v41 }
 0x1c9   : > { %1619 = vmatmul.msk.bf16.gmra.mxu2 %vm689_vm4, %v679_v25 }
 0x23b   : > { %v779_v42 = vpop.f32.mrf.mxu1 }
 0x23c   : > { %v708_v43 = vpop.f32.mrf.mxu2  ;;  %v784_v44 = vadd.f32 %v1838_v40, %v779_v42  ;;  %v2155_v45 = vadd.f32 %v790_v28, %v779_v42  ;;  %v1787_v42 = vld [vmem:[%s2411_s3 + $0x3c] sm:$0xff] }
 0x23d   : > { %v719_v49 = vmul.f32 0.05, %v708_v43  ;;  %1020 = vmatpush.bf16.msrb.mxu0 %v1787_v42 }
 0x23e   : > { %v785_v46 = vmul.f32 0.2, %v784_v44  ;;  %979 = vrot.lane.b32.xlu2 %v2155_v45, %s1908_s24 }
 0x23f   : > { %v2161_v53 = vadd.f32 %v719_v49, %v2012_v10 }
 0x240   : > { %v786_v47 = vmax.f32 %v784_v44, %v785_v46 }
 0x242   : > { %v867_v48 = vpack.c.bf16 %v786_v47, %v786_v47 }
 0x243   : > { %v781_v51 = vpop.f32.mrf.mxu1 }
 0x244   : > { %v710_v50 = vpop.f32.mrf.mxu2  ;;  %1667 = vmatmul.msk.bf16.vlgmr.msra.gmra.mxu0 %vm410_vm1, %v867_v48  ;;  %v1786_v51 = vld [vmem:[%s2411_s3 + $0x34] sm:$0xff] }
 0x245   : > { %v720_v52 = vmul.f32 0.05, %v710_v50  ;;  %1021 = vmatpush.bf16.msrb.mxu0 %v1786_v51 }
 0x247   : > { %v2164_v54 = vadd.f32 %v720_v52, %v2014_v11 }
 0x249   : > { %v793_v55 = vpack.c.bf16 %v2164_v54, %v2161_v53 }
 0x24b   : > { %1657 = vmatmul.msk.bf16.vlgmr.msrb.gmra.mxu3 %vm445_vm0, %v793_v55 }
 0x24c   : > { %v713_v56 = vpop.f32.mrf.mxu2 }
 0x24d   : > { %v721_v57 = vmul.f32 0.05, %v713_v56  ;;  %v1839_v56 = vld [vmem:[%s2414_s6 + $0x6] ss:$0 sm:$0xff] }
 0x24f   : > { %v2170_v59 = vadd.f32 %v721_v57, %v2016_v12 }
 0x251   : > { %v794_v60 = vpack.c.bf16 %v2170_v59, %v2170_v59 }
 0x254   : > { %v715_v58 = vpop.f32.mrf.mxu2 }
 0x25b   : > { %1658 = vmatmul.msk.bf16.gmra.mxu3 %vm445_vm0, %v794_v60 }
 0x298   : > { %v2217_v57 = vpop.permute.xlu2 %979 }
 0x2c1   : > { %v2175_v10 = vpop.f32.mrf.mxu0 }
 0x2c2   : > { %v894_v58 = vadd.f32 %v1839_v56, %v2175_v10 }
 0x2c4   : > { %v897_v60 = vmul.f32 0.2, %v894_v58 }
 0x2c9   : > { %v895_v11 = vpop.f32.mrf.mxu0 }
 0x2ce   : > { %v2177_v61 = vpop.f32.mrf.mxu3 }
 0x2cf   : > { %v825_v0 = vmul.f32 %v2177_v61, %v2177_v61 }
 0x2d1   : > { %v828_v3 = vsel %vm445_vm0, %v825_v0, 0.0  ;;  %v973_v4 = vsel %vm618_vm2, %v825_v0, 0.0 }
 0x2d6   : > { %v2179_v62 = vpop.f32.mrf.mxu3 }
 0x2d7   : > { %v826_v63 = vmul.f32 %v2179_v62, %v2179_v62 }
 0x2d9   : > { %v829_v12 = vsel %vm445_vm0, %v826_v63, 0.0  ;;  %v974_v1 = vsel %vm618_vm2, %v826_v63, 0.0  ;;  %v898_v63 = vmax.f32 %v894_v58, %v897_v60  ;;  %v982_v58 = vmul.f32 %v2217_v57, %v2177_v61 }
 0x2da   : > { %v830_v6 = vadd.f32 %v829_v12, %v828_v3  ;;  %v975_v7 = vadd.f32 %v974_v1, %v973_v4  ;;  %v983_v60 = vmul.f32 %v2217_v57, %v2179_v62 }
 0x2de   : > { %v2187_v2 = vpop.f32.mrf.mxu3 }
 0x2df   : > { %v827_v5 = vmul.f32 %v2187_v2, %v2187_v2 }
 0x2e1   : > { %v831_v8 = vsel %vm445_vm0, %v827_v5, 0.0  ;;  %v976_v9 = vsel %vm618_vm2, %v827_v5, 0.0  ;;  %v1792_v5 = vld [vmem:[%s2410_s2 + $0x28] sm:$0xff] }
 0x2e2   : > { %v832_v13 = vadd.f32 %v831_v8, %v830_v6  ;;  %v977_v14 = vadd.f32 %v976_v9, %v975_v7  ;;  %1127 = vmatpush.bf16.msra.mxu3 %v1792_v5  ;;  %v1791_v6 = vld [vmem:[%s2410_s2 + $0x20] sm:$0xff] }
 0x2e4   : > { %1857 = vrsqrt.f32 %v832_v13  ;;  %986 = vrot.lane.b32.xlu2 %v977_v14, %s1909_s25  ;;  %vm840_vm5 = vcmp.eq.f32.partialorder %v832_v13, inf  ;;  %v843_v26 = vand.u32 2147483648, %v832_v13  ;;  %vm842_vm6 = vcmp.eq.f32.partialorder %v832_v13, 0.0 }
 0x2e6   : > { %v823_v15 = vpop.f32.mrf.mxu3  ;;  %1128 = vmatpush.bf16.msra.mxu3 %v1791_v6 }
 0x2ea   : > { %v1858_v17 = vpop.eup %1857 }
 0x2eb   : > { %v834_v18 = vmul.f32 %v1858_v17, %v832_v13 }
 0x2ed   : > { %v835_v19 = vmul.f32 %v1858_v17, %v834_v18 }
 0x2ef   : > { %v836_v20 = vmul.f32 0.5, %v835_v19 }
 0x2f1   : > { %v837_v22 = vsub.f32 1.5, %v836_v20 }
 0x2f3   : > { %v838_v23 = vmul.f32 %v1858_v17, %v837_v22 }
 0x2f5   : > { %v839_v24 = vmul.f32 %v838_v23, %v832_v13 }
 0x2f7   : > { %v841_v29 = vsel %vm840_vm5, %v832_v13, %v839_v24  ;;  %v1639_v24 = vld [vmem:[%s2413_s5 + $0x24] sm:$0xf] }
 0x2f8   : > { %v844_v30 = vsel %vm842_vm6, %v843_v26, %v841_v29  ;;  %v1841_v26 = vld [vmem:[%s2414_s6 + $0x9] ss:$0 sm:$0xff]  ;;  %v1037_v27 = vunpack.c.l.b16 %v1639_v24 }
 0x2f9   : > { %v845_v32 = vsub.f32 0.0, %v844_v30  ;;  %1140 = vrot.lane.b32.xlu0 %v1841_v26, %s1907_s15 }
 0x2fa   : > { %v1039_v30 = vpack.c.b16 %v1037_v27, %v1037_v27 }
 0x2fb   : > { %v846_v33 = vmul.f32 1.442695, %v845_v32 }
 0x2fd   : > { %1859 = vpow2.f32 %v846_v33  ;;  %v1840_v33 = vld [vmem:[%s2414_s6 + $0x7] ss:$0 sm:$0xff] }
 0x303   : > { %v1860_v34 = vpop.eup %1859 }
 0x304   : > { %v848_v35 = vadd.f32 1.0, %v1860_v34  ;;  %v1048_v34 = vsel %vm658_vm9, %v1039_v30, 0 }
 0x305   : > { %1056 = vmatpush.bf16.msrb.mxu2 %v1048_v34 }
 0x306   : > { %1861 = vrcp.f32 %v848_v35  ;;  %v860_v16 = vand.u32 2147483648, %v848_v35  ;;  %v858_v28 = vand.u32 2147483647, %v848_v35  ;;  %vm854_vm8 = vweird.f32 %v848_v35 }
 0x308   : > { %v861_v44 = vor.u32 1.1754944e-38, %v860_v16  ;;  %vm859_vm12 = vcmp.eq.f32.partialorder %v858_v28, 8.507059e+37 }
 0x30c   : > { %v1862_v31 = vpop.eup %1861 }
 0x30d   : > { %v850_v37 = vmul.f32 %v1862_v31, %v848_v35  ;;  %vm855_vm7 = vweird.f32 %v1862_v31 }
 0x30e   : > { %vm856_vm11 = vmor %vm854_vm8, %vm855_vm7 }
 0x30f   : > { %v851_v25 = vsub.f32 1.0, %v850_v37  ;;  %v1790_v37 = vld [vmem:[%s2413_s5 + $0x1c] sm:$0xff] }
 0x310   : > { %1057 = vmatpush.bf16.msrb.mxu2 %v1790_v37 }
 0x311   : > { %v852_v40 = vmul.f32 %v1862_v31, %v851_v25 }
 0x313   : > { %v853_v43 = vadd.f32 %v1862_v31, %v852_v40 }
 0x315   : > { %v857_v46 = vsel %vm856_vm11, %v1862_v31, %v853_v43 }
 0x316   : > { %v862_v47 = vsel %vm859_vm12, %v861_v44, %v857_v46 }
 0x317   : > { %v864_v48 = vmul.f32 %v862_v47, %v2177_v61  ;;  %v865_v49 = vmul.f32 %v862_v47, %v2179_v62  ;;  %v866_v52 = vmul.f32 %v862_v47, %v2187_v2  ;;  %v1794_v62 = vld [vmem:[%s2411_s3 + $0x50] sm:$0xff] }
 0x318   : > { %1241 = vmatpush.bf16.msrb.mxu1 %v1794_v62 }
 0x319   : > { %v899_v50 = vpack.c.bf16 %v865_v49, %v864_v48  ;;  %v900_v55 = vpack.c.bf16 %v866_v52, %v866_v52 }
 0x31b   : > { %1672 = vmatmul.msk.bf16.vlgmr.msra.gmra.mxu1 %vm445_vm0, %v899_v50 }
 0x32b   : > { %1673 = vmatmul.msk.bf16.gmra.mxu1 %vm445_vm0, %v900_v55 }
 0x33e   : > { %v987_v11 = vpop.permute.xlu2 %986 }
 0x33f   : > { %v989_v0 = vmul.f32 %v987_v11, %v2155_v45 }
 0x341   : > { %v990_v12 = vsel %vm410_vm1, %v898_v63, %v989_v0  ;;  %v984_v63 = vmul.f32 %v2217_v57, %v2187_v2  ;;  %v1793_v2 = vld [vmem:[%s2411_s3 + $0x48] sm:$0xff]  ;;  %v1797_v57 = vld [vmem:[%s2412_s4 + $0x10] sm:$0xff] }
 0x342   : > { %v991_v1 = vpack.c.bf16 %v990_v12, %v990_v12  ;;  %1242 = vmatpush.bf16.msrb.mxu1 %v1793_v2  ;;  %1165 = vmatpush.bf16.msra.mxu0 %v1797_v57 }
 0x344   : > { %1682 = vmatmul.msk.bf16.vlgmr.msrb.gmra.mxu0 %vm654_vm10, %v991_v1 }
 0x398   : > { %v2223_v3 = vpop.f32.mrf.mxu1 }
 0x399   : > { %v931_v45 = vmul.f32 %v2223_v3, %v2223_v3 }
 0x39b   : > { %v934_v9 = vsel %vm445_vm0, %v931_v45, 0.0 }
 0x3a0   : > { %v2225_v4 = vpop.f32.mrf.mxu1 }
 0x3a1   : > { %v932_v10 = vmul.f32 %v2225_v4, %v2225_v4 }
 0x3a3   : > { %v935_v7 = vsel %vm445_vm0, %v932_v10, 0.0 }
 0x3a4   : > { %v936_v14 = vadd.f32 %v935_v7, %v934_v9 }
 0x3a8   : > { %v927_v8 = vpop.f32.mrf.mxu1 }
 0x3a9   : > { %v933_v13 = vmul.f32 %v927_v8, %v927_v8 }
 0x3ab   : > { %v937_v15 = vsel %vm445_vm0, %v933_v13, 0.0 }
 0x3ac   : > { %v938_v17 = vadd.f32 %v937_v15, %v936_v14 }
 0x3ae   : > { %1863 = vrsqrt.f32 %v938_v17  ;;  %vm946_vm13 = vcmp.eq.f32.partialorder %v938_v17, inf  ;;  %v949_v21 = vand.u32 2147483648, %v938_v17  ;;  %vm948_vm14 = vcmp.eq.f32.partialorder %v938_v17, 0.0 }
 0x3b0   : > { %v929_v18 = vpop.f32.mrf.mxu1 }
 0x3b4   : > { %v1864_v19 = vpop.eup %1863 }
 0x3b5   : > { %v940_v20 = vmul.f32 %v1864_v19, %v938_v17 }
 0x3b7   : > { %v941_v22 = vmul.f32 %v1864_v19, %v940_v20 }
 0x3b9   : > { %v942_v23 = vmul.f32 0.5, %v941_v22 }
 0x3bb   : > { %v943_v29 = vsub.f32 1.5, %v942_v23 }
 0x3bd   : > { %v944_v32 = vmul.f32 %v1864_v19, %v943_v29 }
 0x3bf   : > { %v945_v35 = vmul.f32 %v944_v32, %v938_v17 }
 0x3c1   : > { %v947_v31 = vsel %vm946_vm13, %v938_v17, %v945_v35  ;;  %v1023_v36 = vpop.f32.mrf.mxu0 }
 0x3c2   : > { %v950_v39 = vsel %vm948_vm14, %v949_v21, %v947_v31  ;;  %v1024_v25 = vadd.f32 %v1840_v33, %v1023_v36 }
 0x3c3   : > { %v951_v16 = vsub.f32 0.0, %v950_v39 }
 0x3c4   : > { %v1068_v41 = vmul.f32 0.5, %v1024_v25 }
 0x3c5   : > { %v952_v40 = vmul.f32 1.442695, %v951_v16 }
 0x3c6   : > { %v2255_v28 = vadd.f32 %v1068_v41, %v2137_v38 }
 0x3c7   : > { %1865 = vpow2.f32 %v952_v40 }
 0x3c8   : > { %v1105_v42 = vpack.c.bf16 %v2255_v28, %v2255_v28 }
 0x3c9   : > { %v1025_v43 = vpop.f32.mrf.mxu0 }
 0x3ca   : > { %1721 = vmatmul.msk.bf16.vlgmr.msra.gmra.mxu3 %vm410_vm1, %v1105_v42 }
 0x3cd   : > { %v1866_v44 = vpop.eup %1865 }
 0x3ce   : > { %v954_v46 = vadd.f32 1.0, %v1866_v44 }
 0x3d0   : > { %1867 = vrcp.f32 %v954_v46  ;;  %v966_v50 = vand.u32 2147483648, %v954_v46  ;;  %v964_v52 = vand.u32 2147483647, %v954_v46  ;;  %vm960_vm3 = vweird.f32 %v954_v46 }
 0x3d2   : > { %v967_v38 = vor.u32 1.1754944e-38, %v966_v50  ;;  %vm965_vm6 = vcmp.eq.f32.partialorder %v964_v52, 8.507059e+37 }
 0x3d6   : > { %v1868_v47 = vpop.eup %1867 }
 0x3d7   : > { %v956_v48 = vmul.f32 %v1868_v47, %v954_v46  ;;  %vm961_vm15 = vweird.f32 %v1868_v47 }
 0x3d8   : > { %vm962_vm5 = vmor %vm960_vm3, %vm961_vm15 }
 0x3d9   : > { %v957_v49 = vsub.f32 1.0, %v956_v48 }
 0x3db   : > { %v958_v51 = vmul.f32 %v1868_v47, %v957_v49 }
 0x3dd   : > { %v959_v55 = vadd.f32 %v1868_v47, %v958_v51 }
 0x3df   : > { %v963_v56 = vsel %vm962_vm5, %v1868_v47, %v959_v55 }
 0x3e0   : > { %v968_v11 = vsel %vm965_vm6, %v967_v38, %v963_v56 }
 0x3e1   : > { %v970_v0 = vmul.f32 %v968_v11, %v2223_v3  ;;  %v971_v12 = vmul.f32 %v968_v11, %v2225_v4  ;;  %v972_v1 = vmul.f32 %v968_v11, %v927_v8  ;;  %v1842_v3 = vld [vmem:[%s2414_s6 + $0x8] ss:$0 sm:$0xff]  ;;  %v1141_v4 = vpop.permute.xlu0 %1140 }
 0x3e3   : > { %v1027_v5 = vsel %vm445_vm0, %v970_v0, %v982_v58  ;;  %v1028_v10 = vsel %vm445_vm0, %v971_v12, %v983_v60  ;;  %v1029_v45 = vsel %vm445_vm0, %v972_v1, %v984_v63  ;;  %v1798_v58 = vld [vmem:[%s2413_s5 + $0x28] sm:$0xff] }
 0x3e4   : > { %v1030_v6 = vpack.c.bf16 %v1028_v10, %v1027_v5  ;;  %v1031_v61 = vpack.c.bf16 %v1029_v45, %v1029_v45  ;;  %1271 = vmatpush.bf16.msrb.mxu3 %v1798_v58  ;;  %v1701_v5 = vld [vmem:[%s2411_s3 + $0x68] sm:$0xf] }
 0x3e5   : > { %v1353_v45 = vunpack.c.l.b16 %v1701_v5 }
 0x3e6   : > { %1687 = vmatmul.msk.bf16.vlgmr.msrb.gmra.mxu2 %vm689_vm4, %v1030_v6 }
 0x3f6   : > { %1688 = vmatmul.msk.bf16.gmra.mxu2 %vm689_vm4, %v1031_v61  ;;  %v1356_v61 = vpack.c.b16 %v1353_v45, %v1353_v45 }
 0x3f8   : > { %v1363_v57 = vsel %vm658_vm9, %v1356_v61, 0 }
 0x3f9   : > { %1370 = vmatpush.bf16.msra.mxu2 %v1363_v57 }
 0x44d   : > { %v1130_v7 = vpop.f32.mrf.mxu3 }
 0x44e   : > { %v1135_v8 = vadd.f32 %v1842_v3, %v1130_v7  ;;  %v2285_v9 = vadd.f32 %v1141_v4, %v1130_v7  ;;  %v1796_v7 = vld [vmem:[%s2411_s3 + $0x60] sm:$0xff] }
 0x44f   : > { %1371 = vmatpush.bf16.msra.mxu2 %v1796_v7 }
 0x450   : > { %v1136_v13 = vmul.f32 0.2, %v1135_v8  ;;  %1330 = vrot.lane.b32.xlu1 %v2285_v9, %s1908_s24 }
 0x452   : > { %v1137_v14 = vmax.f32 %v1135_v8, %v1136_v13 }
 0x454   : > { %v1218_v15 = vpack.c.bf16 %v1137_v14, %v1137_v14 }
 0x455   : > { %v1132_v17 = vpop.f32.mrf.mxu3 }
 0x456   : > { %1736 = vmatmul.msk.bf16.vlgmr.msrb.gmra.mxu1 %vm410_vm1, %v1218_v15 }
 0x469   : > { %v1059_v18 = vpop.f32.mrf.mxu2 }
 0x46a   : > { %v1070_v19 = vmul.f32 0.05, %v1059_v18 }
 0x46c   : > { %v2291_v23 = vadd.f32 %v1070_v19, %v2161_v53 }
 0x471   : > { %v1061_v20 = vpop.f32.mrf.mxu2 }
 0x472   : > { %v1071_v22 = vmul.f32 0.05, %v1061_v20  ;;  %v1795_v20 = vld [vmem:[%s2411_s3 + $0x58] sm:$0xff] }
 0x473   : > { %1372 = vmatpush.bf16.msra.mxu2 %v1795_v20 }
 0x474   : > { %v2294_v24 = vadd.f32 %v1071_v22, %v2164_v54 }
 0x476   : > { %v1144_v26 = vpack.c.bf16 %v2294_v24, %v2291_v23 }
 0x478   : > { %1726 = vmatmul.msk.bf16.vlgmr.msra.gmra.mxu0 %vm445_vm0, %v1144_v26 }
 0x479   : > { %v1064_v27 = vpop.f32.mrf.mxu2 }
 0x47a   : > { %v1072_v29 = vmul.f32 0.05, %v1064_v27  ;;  %v1843_v27 = vld [vmem:[%s2414_s6 + $0xa] ss:$0 sm:$0xff] }
 0x47c   : > { %v2300_v32 = vadd.f32 %v1072_v29, %v2170_v59 }
 0x47e   : > { %v1145_v33 = vpack.c.bf16 %v2300_v32, %v2300_v32 }
 0x481   : > { %v1066_v30 = vpop.f32.mrf.mxu2 }
 0x488   : > { %1727 = vmatmul.msk.bf16.gmra.mxu0 %vm445_vm0, %v1145_v33 }
 0x4d3   : > { %v2305_v53 = vpop.f32.mrf.mxu1 }
 0x4d4   : > { %v1245_v29 = vadd.f32 %v1843_v27, %v2305_v53 }
 0x4d6   : > { %v1248_v30 = vmul.f32 0.2, %v1245_v29 }
 0x4db   : > { %v1246_v54 = vpop.f32.mrf.mxu1 }
 0x4dc   : > { %v1249_v54 = vmax.f32 %v1245_v29, %v1248_v30 }
 0x4f5   : > { %v2307_v34 = vpop.f32.mrf.mxu0 }
 0x4f6   : > { %v1176_v31 = vmul.f32 %v2307_v34, %v2307_v34 }
 0x4f8   : > { %v1179_v39 = vsel %vm445_vm0, %v1176_v31, 0.0  ;;  %v1324_v25 = vsel %vm618_vm2, %v1176_v31, 0.0 }
 0x4fd   : > { %v2309_v35 = vpop.f32.mrf.mxu0 }
 0x4fe   : > { %v1177_v21 = vmul.f32 %v2309_v35, %v2309_v35 }
 0x500   : > { %v1180_v59 = vsel %vm445_vm0, %v1177_v21, 0.0  ;;  %v1325_v36 = vsel %vm618_vm2, %v1177_v21, 0.0 }
 0x501   : > { %v1181_v41 = vadd.f32 %v1180_v59, %v1179_v39  ;;  %v1326_v40 = vadd.f32 %v1325_v36, %v1324_v25 }
 0x505   : > { %v2317_v37 = vpop.f32.mrf.mxu0 }
 0x506   : > { %v1178_v16 = vmul.f32 %v2317_v37, %v2317_v37 }
 0x508   : > { %v1182_v42 = vsel %vm445_vm0, %v1178_v16, 0.0  ;;  %v1327_v43 = vsel %vm618_vm2, %v1178_v16, 0.0 }
 0x509   : > { %v1183_v44 = vadd.f32 %v1182_v42, %v1181_v41  ;;  %v1328_v46 = vadd.f32 %v1327_v43, %v1326_v40 }
 0x50b   : > { %1869 = vrsqrt.f32 %v1183_v44  ;;  %1337 = vrot.lane.b32.xlu2 %v1328_v46, %s1909_s25  ;;  %vm1191_vm7 = vcmp.eq.f32.partialorder %v1183_v44, inf  ;;  %v1194_v56 = vand.u32 2147483648, %v1183_v44  ;;  %vm1193_vm2 = vcmp.eq.f32.partialorder %v1183_v44, 0.0 }
 0x50d   : > { %v1174_v47 = vpop.f32.mrf.mxu0 }
 0x511   : > { %v1870_v48 = vpop.eup %1869 }
 0x512   : > { %v1185_v49 = vmul.f32 %v1870_v48, %v1183_v44 }
 0x514   : > { %v1186_v50 = vmul.f32 %v1870_v48, %v1185_v49 }
 0x516   : > { %v1187_v51 = vmul.f32 0.5, %v1186_v50 }
 0x518   : > { %v1188_v52 = vsub.f32 1.5, %v1187_v51  ;;  %v1708_v51 = vld [vmem:[%s2413_s5 + $0x38] sm:$0xf] }
 0x51a   : > { %v1189_v55 = vmul.f32 %v1870_v48, %v1188_v52  ;;  %v1388_v52 = vunpack.c.l.b16 %v1708_v51 }
 0x51c   : > { %v1190_v38 = vmul.f32 %v1189_v55, %v1183_v44 }
 0x51e   : > { %v1192_v60 = vsel %vm1191_vm7, %v1183_v44, %v1190_v38  ;;  %v1390_v38 = vpack.c.b16 %v1388_v52, %v1388_v52  ;;  %vm1494_vm7 = vcmask 31744  }
 0x51f   : > { %v1195_v11 = vsel %vm1193_vm2, %v1194_v56, %v1192_v60 }
 0x520   : > { %v1196_v63 = vsub.f32 0.0, %v1195_v11  ;;  %v1399_v58 = vsel %vm658_vm9, %v1390_v38, 0 }
 0x521   : > { %1407 = vmatpush.bf16.msra.mxu1 %v1399_v58 }
 0x522   : > { %v1197_v0 = vmul.f32 1.442695, %v1196_v63 }
 0x524   : > { %1871 = vpow2.f32 %v1197_v0 }
 0x52a   : > { %v1872_v12 = vpop.eup %1871 }
 0x52b   : > { %v1199_v1 = vadd.f32 1.0, %v1872_v12  ;;  %v1799_v12 = vld [vmem:[%s2413_s5 + $0x30] sm:$0xff] }
 0x52c   : > { %1408 = vmatpush.bf16.msra.mxu1 %v1799_v12 }
 0x52d   : > { %1873 = vrcp.f32 %v1199_v1  ;;  %v1211_v2 = vand.u32 2147483648, %v1199_v1  ;;  %v1209_v4 = vand.u32 2147483647, %v1199_v1  ;;  %vm1205_vm11 = vweird.f32 %v1199_v1 }
 0x52f   : > { %v1212_v13 = vor.u32 1.1754944e-38, %v1211_v2  ;;  %vm1210_vm13 = vcmp.eq.f32.partialorder %v1209_v4, 8.507059e+37 }
 0x533   : > { %v1874_v10 = vpop.eup %1873 }
 0x534   : > { %v1201_v6 = vmul.f32 %v1874_v10, %v1199_v1  ;;  %vm1206_vm8 = vweird.f32 %v1874_v10 }
 0x535   : > { %vm1207_vm12 = vmor %vm1205_vm11, %vm1206_vm8 }
 0x536   : > { %v1202_v62 = vsub.f32 1.0, %v1201_v6 }
 0x538   : > { %v1203_v3 = vmul.f32 %v1874_v10, %v1202_v62 }
 0x53a   : > { %v1204_v8 = vadd.f32 %v1874_v10, %v1203_v3 }
 0x53c   : > { %v1208_v14 = vsel %vm1207_vm12, %v1874_v10, %v1204_v8 }
 0x53d   : > { %v1213_v15 = vsel %vm1210_vm13, %v1212_v13, %v1208_v14  ;;  %v1331_v14 = vpop.permute.xlu1 %1330 }
 0x53e   : > { %v1215_v17 = vmul.f32 %v1213_v15, %v2307_v34  ;;  %v1216_v18 = vmul.f32 %v1213_v15, %v2309_v35  ;;  %v1217_v22 = vmul.f32 %v1213_v15, %v2317_v37  ;;  %v1335_v20 = vmul.f32 %v1331_v14, %v2317_v37 }
 0x540   : > { %v1250_v19 = vpack.c.bf16 %v1216_v18, %v1215_v17  ;;  %v1251_v26 = vpack.c.bf16 %v1217_v22, %v1217_v22  ;;  %v1333_v17 = vmul.f32 %v1331_v14, %v2307_v34  ;;  %v1334_v18 = vmul.f32 %v1331_v14, %v2309_v35 }
 0x542   : > { %1741 = vmatmul.msk.bf16.vlgmr.msrb.gmra.mxu3 %vm445_vm0, %v1250_v19 }
 0x552   : > { %1742 = vmatmul.msk.bf16.gmra.mxu3 %vm445_vm0, %v1251_v26 }
 0x565   : > { %v1338_v33 = vpop.permute.xlu2 %1337 }
 0x566   : > { %v1340_v21 = vmul.f32 %v1338_v33, %v2285_v9 }
 0x568   : > { %v1341_v31 = vsel %vm410_vm1, %v1249_v54, %v1340_v21 }
 0x569   : > { %v1342_v59 = vpack.c.bf16 %v1341_v31, %v1341_v31 }
 0x56b   : > { %1751 = vmatmul.msk.bf16.vlgmr.msra.gmra.mxu2 %vm654_vm10, %v1342_v59 }
 0x5c5   : > { %v1273_v36 = vpop.f32.mrf.mxu3 }
 0x5c6   : > { %v1282_v16 = vmul.f32 %v1273_v36, %v1273_v36 }
 0x5c8   : > { %v1285_v42 = vsel %vm445_vm0, %v1282_v16, 0.0 }
 0x5cd   : > { %v1275_v39 = vpop.f32.mrf.mxu3 }
 0x5ce   : > { %v1283_v25 = vmul.f32 %v1275_v39, %v1275_v39 }
 0x5d0   : > { %v1286_v41 = vsel %vm445_vm0, %v1283_v25, 0.0  ;;  %v1802_v25 = vld [vmem:[%s2415_s7 + $0x10] sm:$0xff] }
 0x5d1   : > { %v1287_v43 = vadd.f32 %v1286_v41, %v1285_v42  ;;  %1486 = vmatpush.bf16.msrb.mxu0 %v1802_v25  ;;  %v1801_v42 = vld [vmem:[%s2415_s7 + $0x8] sm:$0xff] }
 0x5d5   : > { %v1278_v40 = vpop.f32.mrf.mxu3  ;;  %1487 = vmatpush.bf16.msrb.mxu0 %v1801_v42 }
 0x5d6   : > { %v1284_v53 = vmul.f32 %v1278_v40, %v1278_v40 }
 0x5d8   : > { %v1288_v44 = vsel %vm445_vm0, %v1284_v53, 0.0 }
 0x5d9   : > { %v1289_v46 = vadd.f32 %v1288_v44, %v1287_v43  ;;  %v1800_v44 = vld [vmem:[%s2415_s7] sm:$0xff] }
 0x5da   : > { %1488 = vmatpush.bf16.msrb.mxu0 %v1800_v44 }
 0x5db   : > { %1875 = vrsqrt.f32 %v1289_v46  ;;  %vm1297_vm10 = vcmp.eq.f32.partialorder %v1289_v46, inf  ;;  %v1300_v11 = vand.u32 2147483648, %v1289_v46  ;;  %vm1299_vm14 = vcmp.eq.f32.partialorder %v1289_v46, 0.0 }
 0x5dd   : > { %v1280_v9 = vpop.f32.mrf.mxu3 }
 0x5e1   : > { %v1876_v47 = vpop.eup %1875 }
 0x5e2   : > { %v1291_v48 = vmul.f32 %v1876_v47, %v1289_v46 }
 0x5e4   : > { %v1292_v49 = vmul.f32 %v1876_v47, %v1291_v48 }
 0x5e6   : > { %v1293_v50 = vmul.f32 0.5, %v1292_v49 }
 0x5e8   : > { %v1294_v55 = vsub.f32 1.5, %v1293_v50 }
 0x5ea   : > { %v1295_v56 = vmul.f32 %v1876_v47, %v1294_v55 }
 0x5ec   : > { %v1296_v60 = vmul.f32 %v1295_v56, %v1289_v46 }
 0x5ee   : > { %v1298_v63 = vsel %vm1297_vm10, %v1289_v46, %v1296_v60  ;;  %v2358_v0 = vpop.f32.mrf.mxu2 }
 0x5ef   : > { %v1301_v1 = vsel %vm1299_vm14, %v1300_v11, %v1298_v63  ;;  %v1844_v11 = vld [vmem:[%s2414_s6 + $0xb] ss:$0 sm:$0xff] }
 0x5f0   : > { %v1302_v5 = vsub.f32 0.0, %v1301_v1  ;;  %v1375_v63 = vadd.f32 %v1844_v11, %v2358_v0 }
 0x5f2   : > { %v1303_v10 = vmul.f32 1.442695, %v1302_v5  ;;  %v1419_v12 = vmul.f32 0.5, %v1375_v63 }
 0x5f4   : > { %1877 = vpow2.f32 %v1303_v10  ;;  %v1420_v1 = vadd.f32 %v1419_v12, %v2255_v28 }
 0x5f6   : > { %v1376_v45 = vpop.f32.mrf.mxu2 }
 0x5fa   : > { %v1878_v6 = vpop.eup %1877 }
 0x5fb   : > { %v1305_v61 = vadd.f32 1.0, %v1878_v6 }
 0x5fd   : > { %1879 = vrcp.f32 %v1305_v61  ;;  %v1317_v3 = vand.u32 2147483648, %v1305_v61  ;;  %v1315_v7 = vand.u32 2147483647, %v1305_v61  ;;  %vm1311_vm15 = vweird.f32 %v1305_v61 }
 0x5ff   : > { %v1318_v13 = vor.u32 1.1754944e-38, %v1317_v3  ;;  %vm1316_vm5 = vcmp.eq.f32.partialorder %v1315_v7, 8.507059e+37 }
 0x603   : > { %v1880_v62 = vpop.eup %1879 }
 0x604   : > { %v1307_v2 = vmul.f32 %v1880_v62, %v1305_v61  ;;  %vm1312_vm9 = vweird.f32 %v1880_v62 }
 0x605   : > { %vm1313_vm3 = vmor %vm1311_vm15, %vm1312_vm9 }
 0x606   : > { %v1308_v57 = vsub.f32 1.0, %v1307_v2 }
 0x608   : > { %v1309_v4 = vmul.f32 %v1880_v62, %v1308_v57 }
 0x60a   : > { %v1310_v8 = vadd.f32 %v1880_v62, %v1309_v4 }
 0x60c   : > { %v1314_v15 = vsel %vm1313_vm3, %v1880_v62, %v1310_v8 }
 0x60d   : > { %v1319_v19 = vsel %vm1316_vm5, %v1318_v13, %v1314_v15 }
 0x60e   : > { %v1321_v22 = vmul.f32 %v1319_v19, %v1273_v36  ;;  %v1322_v26 = vmul.f32 %v1319_v19, %v1275_v39  ;;  %v1323_v27 = vmul.f32 %v1319_v19, %v1278_v40 }
 0x610   : > { %v1378_v29 = vsel %vm445_vm0, %v1321_v22, %v1333_v17  ;;  %v1379_v30 = vsel %vm445_vm0, %v1322_v26, %v1334_v18  ;;  %v1380_v33 = vsel %vm445_vm0, %v1323_v27, %v1335_v20 }
 0x611   : > { %v1381_v54 = vpack.c.bf16 %v1379_v30, %v1378_v29  ;;  %v1382_v21 = vpack.c.bf16 %v1380_v33, %v1380_v33 }
 0x613   : > { %1756 = vmatmul.msk.bf16.vlgmr.msra.gmra.mxu1 %vm689_vm4, %v1381_v54 }
 0x623   : > { %1757 = vmatmul.msk.bf16.gmra.mxu1 %vm689_vm4, %v1382_v21 }
 0x690   : > { %v1410_v34 = vpop.f32.mrf.mxu1 }
 0x691   : > { %v1421_v31 = vmul.f32 0.05, %v1410_v34 }
 0x693   : > { %v1424_v36 = vadd.f32 %v1421_v31, %v2291_v23 }
 0x695   : > { %v1427_v41 = vmul.f32 %v1424_v36, %v1424_v36 }
 0x698   : > { %v1412_v35 = vpop.f32.mrf.mxu1 }
 0x699   : > { %v1422_v59 = vmul.f32 0.05, %v1412_v35 }
 0x69b   : > { %v1425_v37 = vadd.f32 %v1422_v59, %v2294_v24  ;;  %v1430_v24 = vsel %vm445_vm0, %v1427_v41, 0.0 }
 0x69d   : > { %v1428_v39 = vmul.f32 %v1425_v37, %v1425_v37 }
 0x69f   : > { %v1431_v53 = vsel %vm445_vm0, %v1428_v39, 0.0 }
 0x6a0   : > { %v1415_v16 = vpop.f32.mrf.mxu1  ;;  %v1432_v46 = vadd.f32 %v1431_v53, %v1430_v24 }
 0x6a1   : > { %v1423_v40 = vmul.f32 0.05, %v1415_v16 }
 0x6a3   : > { %v1426_v43 = vadd.f32 %v1423_v40, %v2300_v32 }
 0x6a5   : > { %v1429_v23 = vmul.f32 %v1426_v43, %v1426_v43 }
 0x6a7   : > { %v1433_v9 = vsel %vm445_vm0, %v1429_v23, 0.0  ;;  %vm1477_vm0 = vcmask 392192  }
 0x6a8   : > { %v1434_v47 = vadd.f32 %v1433_v9, %v1432_v46  ;;  %v1417_v48 = vpop.f32.mrf.mxu1 }
 0x6aa   : > { %1881 = vrsqrt.f32 %v1434_v47  ;;  %vm1442_vm4 = vcmp.eq.f32.partialorder %v1434_v47, inf  ;;  %v1445_v56 = vand.u32 2147483648, %v1434_v47  ;;  %vm1444_vm6 = vcmp.eq.f32.partialorder %v1434_v47, 0.0 }
 0x6b0   : > { %v1882_v49 = vpop.eup %1881 }
 0x6b1   : > { %v1436_v50 = vmul.f32 %v1882_v49, %v1434_v47 }
 0x6b3   : > { %v1437_v51 = vmul.f32 %v1882_v49, %v1436_v50 }
 0x6b5   : > { %v1438_v52 = vmul.f32 0.5, %v1437_v51 }
 0x6b7   : > { %v1439_v32 = vsub.f32 1.5, %v1438_v52 }
 0x6b9   : > { %v1440_v55 = vmul.f32 %v1882_v49, %v1439_v32 }
 0x6bb   : > { %v1441_v38 = vmul.f32 %v1440_v55, %v1434_v47 }
 0x6bd   : > { %v1443_v58 = vsel %vm1442_vm4, %v1434_v47, %v1441_v38 }
 0x6be   : > { %v1446_v60 = vsel %vm1444_vm6, %v1445_v56, %v1443_v58 }
 0x6bf   : > { %1448 = vrot.lane.b32.xlu0 %v1446_v60, %s1907_s15  ;;  %s363_s15 = scalar_lea.vmem %s2416_s8, %s1573_s14 }
 0x731   : > { %v1449_v5 = vpop.permute.xlu0 %1448 }
 0x732   : > { %v1451_v10 = vsel %vm410_vm1, %v1420_v1, %v1449_v5 }
 0x733   : > { %v1458_v45 = vpack.c.bf16 %v1451_v10, %v1451_v10 }
 0x735   : > { %1770 = vmatmul.msk.bf16.vlgmr.msrb.gmra.mxu0 %vm1477_vm0, %v1458_v45 }
 0x7b2   : > { %v1490_v6 = vpop.f32.mrf.mxu0 }
 0x7b3   : > { %1495 = vst.msk [vmem:[%s363_s15] sm:$0xff] %vm1494_vm7, %v1490_v6 }
 0x7ba   : > { %v1492_v61 = vpop.f32.mrf.mxu0 }
 0x7bb PF: > { %p15_p9 = scmp.ge.s32.totalorder %s1972_s9, 4   ;;  %s2417_s27 = smov %s1901_s28 }
 0x7bc   : > { %s2418_s28 = smov %s1981_s12  ;;  %s2419_s29 = smov %s1972_s9 }
 0x7bd   :  { %17 = sbr.rel (!%p15_p9) target bundleno = 2 (0x2), region = 138 }

</bundles_post_ra>
